<compile_context>
chip_gen: v5e
topology: v5e:2x2
jax: 0.10.0
libtpu: 0.0.40
codegen_flags: <defaults>
</compile_context>

<pallas_src>
import functools

import jax
import jax.numpy as jnp
from jax.experimental import pallas as pl
from jax.experimental.pallas import tpu as pltpu


def _convlstm_kernel(comb_ref, w_ref, b_ref, c_ref, out_ref, *, kh, H, W, hd, hb):
    """One batch element per grid step.

    comb_ref : (1, H+2ph, W, kw*C)  bf16  kx-unrolled, H-padded [x ; h_cur] (NHWC-ish)
    w_ref    : (kh, kw*C, 4*hd)     bf16  conv weight, one slab per ky tap
    b_ref    : (1, 4*hd)            f32   conv bias
    c_ref    : (1, H*W, hd)         f32   current cell state, rows ordered y*W + x
    out_ref  : (1, H*W, OUT_W)      f32   lanes [0:hd) = h_next, [hd:2hd) = c_next
    """
    Kc = comb_ref.shape[-1]
    ch4 = 4 * hd
    out_w = out_ref.shape[-1]
    rows = hb * W                       # spatial rows per band (~128)

    for chunk in range(H // hb):        # static row-band loop (keeps vreg pressure low)
        yb = chunk * hb                 # first output image-row of this band
        rb = yb * W                     # first flattened (y*W + x) row

        # Convolution as kh MXU matmuls with the kw taps folded into K = kw*C.
        acc = None
        for ky in range(kh):
            patch = comb_ref[0, pl.ds(yb + ky, hb), :, :].reshape(rows, Kc)
            part = jnp.dot(patch, w_ref[ky], preferred_element_type=jnp.float32)
            acc = part if acc is None else acc + part
        acc = acc + b_ref[...]          # (1, 4*hd) f32 broadcasts over rows

        # LSTM gates; channel order i, f, o, g matches torch.split.
        # One dense sigmoid over all 4*hd lanes (EUP), then cheap lane slices.
        sig = jax.nn.sigmoid(acc)
        i = sig[:, 0 * hd:1 * hd]
        f = sig[:, 1 * hd:2 * hd]
        o = sig[:, 2 * hd:3 * hd]
        g = jnp.tanh(acc[:, 3 * hd:4 * hd])

        c_cur = c_ref[0, pl.ds(rb, rows), :]
        c_next = f * c_cur + i * g
        h_next = o * jnp.tanh(c_next)

        # Pack [h | c | 0-pad] into a 128-lane slab -> unmasked, lane-dense stores.
        pieces = [h_next, c_next]
        if out_w > 2 * hd:
            pieces.append(jnp.zeros((rows, out_w - 2 * hd), dtype=jnp.float32))
        out_ref[0, pl.ds(rb, rows), :] = jnp.concatenate(pieces, axis=-1)


def conv_lstm_cell_forward(x_nchw, h_nchw, c_nchw, weight_oihw, bias, kernel_size):
    """ConvLSTMCell.forward.  Inputs / outputs in NCHW (PyTorch convention)."""
    kh, kw = kernel_size
    ph, pw = kh // 2, kw // 2

    N, Cin, H, W = x_nchw.shape
    hd = h_nchw.shape[1]
    C = Cin + hd
    Kc = kw * C
    ch4 = 4 * hd
    Hp = H + 2 * ph
    out_w = ((2 * hd + 127) // 128) * 128        # lane-dense packed output width

    # ---- plain-JAX glue: layout, tap folding, weight packing -----------------
    # NCHW -> NHWC so channels map to TPU lanes; bf16 for the MXU operands.
    x = jnp.transpose(x_nchw, (0, 2, 3, 1))
    h = jnp.transpose(h_nchw, (0, 2, 3, 1))
    combined = jnp.concatenate([x, h], axis=-1).astype(jnp.bfloat16)   # (N,H,W,C)

    # Fold the kw taps into the channel (lane) axis, i.e. x-direction im2col:
    #   comb_kx[n, y, x, kx*C + c] = combined_padded_w[n, y, x + kx, c]
    comb_w = jnp.pad(combined, ((0, 0), (0, 0), (pw, pw), (0, 0)))
    comb_kx = jnp.concatenate(
        [comb_w[:, :, kx:kx + W, :] for kx in range(kw)], axis=-1)     # (N,H,W,kw*C)
    comb = jnp.pad(comb_kx, ((0, 0), (ph, ph), (0, 0), (0, 0)))        # (N,Hp,W,kw*C)

    # torch weight (4hd, C, kh, kw) -> (kh, kw*C, 4hd), matching the kx*C + c packing.
    w = (jnp.transpose(weight_oihw, (2, 3, 1, 0))                      # (kh, kw, C, 4hd)
         .reshape(kh, Kc, ch4).astype(jnp.bfloat16))
    b = bias.reshape(1, ch4).astype(jnp.float32)

    # Cell state flattened to (N, H*W, hd), rows ordered as y*W + x (kept f32).
    c_in = jnp.transpose(c_nchw, (0, 2, 3, 1)).reshape(N, H * W, hd).astype(jnp.float32)

    # Row-band size: ~128 spatial rows per band keeps acc/gates in-register.
    hb = max(1, min(H, 128 // max(1, W)))
    while H % hb:
        hb -= 1

    kernel = functools.partial(_convlstm_kernel, kh=kh, H=H, W=W, hd=hd, hb=hb)

    packed = pl.pallas_call(
        kernel,
        out_shape=jax.ShapeDtypeStruct((N, H * W, out_w), jnp.float32),
        grid_spec=pltpu.PrefetchScalarGridSpec(
            num_scalar_prefetch=0,
            grid=(N,),
            in_specs=[
                pl.BlockSpec((1, Hp, W, Kc), lambda n: (n, 0, 0, 0)),
                pl.BlockSpec((kh, Kc, ch4), lambda n: (0, 0, 0)),
                pl.BlockSpec((1, ch4), lambda n: (0, 0)),
                pl.BlockSpec((1, H * W, hd), lambda n: (n, 0, 0)),
            ],
            out_specs=pl.BlockSpec((1, H * W, out_w), lambda n: (n, 0, 0)),
        ),
        compiler_params=pltpu.CompilerParams(
            dimension_semantics=("parallel",),
            vmem_limit_bytes=32 * 1024 * 1024),
    )(comb, w, b, c_in)

    # Unpack the lane-dense slab and go back to NCHW.  Outputs are f32.
    h_next = jnp.transpose(packed[:, :, 0:hd].reshape(N, H, W, hd), (0, 3, 1, 2))
    c_next = jnp.transpose(packed[:, :, hd:2 * hd].reshape(N, H, W, hd), (0, 3, 1, 2))
    return h_next, c_next


def _reference_forward(x, h, c, weight, bias, kernel_size):
    """Pure-JAX f32 reference (lax conv), NCHW, mirrors the PyTorch forward."""
    combined = jnp.concatenate([x, h], axis=1)
    dn = jax.lax.conv_dimension_numbers(combined.shape, weight.shape,
                                        ('NCHW', 'OIHW', 'NCHW'))
    out = jax.lax.conv_general_dilated(combined, weight, (1, 1), 'SAME',
                                       dimension_numbers=dn)
    out = out + bias[None, :, None, None]
    cc_i, cc_f, cc_o, cc_g = jnp.split(out, 4, axis=1)
    i = jax.nn.sigmoid(cc_i)
    f = jax.nn.sigmoid(cc_f)
    o = jax.nn.sigmoid(cc_o)
    g = jnp.tanh(cc_g)
    c_next = f * c + i * g
    h_next = o * jnp.tanh(c_next)
    return h_next, c_next


if __name__ == "__main__":
    # Small deterministic problem: batch=2, input_dim=4, hidden_dim=32,
    # spatial 16x16, kernel (3,3), bias=True.
    N, Cin, H, W = 2, 4, 16, 16
    hidden_dim = 32
    kernel_size = (3, 3)

    key = jax.random.PRNGKey(0)
    kx_, kh_, kc_, kw_, kb_ = jax.random.split(key, 5)

    x = jax.random.normal(kx_, (N, Cin, H, W), dtype=jnp.float32)
    h_cur = jax.random.normal(kh_, (N, hidden_dim, H, W), dtype=jnp.float32)
    c_cur = jax.random.normal(kc_, (N, hidden_dim, H, W), dtype=jnp.float32)

    # Deterministic parameter init (same shapes as nn.Conv2d in the module).
    fan_in = (Cin + hidden_dim) * kernel_size[0] * kernel_size[1]
    bound = 1.0 / (fan_in ** 0.5)
    weight = jax.random.uniform(
        kw_, (4 * hidden_dim, Cin + hidden_dim, kernel_size[0], kernel_size[1]),
        dtype=jnp.float32, minval=-bound, maxval=bound)
    bias = jax.random.uniform(kb_, (4 * hidden_dim,), dtype=jnp.float32,
                              minval=-bound, maxval=bound)

    h_next, c_next = conv_lstm_cell_forward(x, h_cur, c_cur, weight, bias,
                                            kernel_size)
    jax.block_until_ready((h_next, c_next))

    # Correctness check against a pure-f32 reference of the PyTorch forward.
    # The kernel's conv operands are bf16 (as under the module's amp autocast),
    # so allow a few-1e-3 level of rounding difference.
    h_ref, c_ref = _reference_forward(x, h_cur, c_cur, weight, bias, kernel_size)
    assert h_next.shape == h_ref.shape and c_next.shape == c_ref.shape
    assert jnp.allclose(h_next, h_ref, atol=3e-2, rtol=3e-2), "h mismatch"
    assert jnp.allclose(c_next, c_ref, atol=3e-2, rtol=3e-2), "c mismatch"

    print("KERNEL_OK")
</pallas_src>

<mosaic_0001>
module attributes {stable_mosaic.version = 11 : i64} {
  func.func @_convlstm_kernel(%arg0: i32, %arg1: memref<1x18x16x108xbf16, #tpu.memory_space<vmem>>, %arg2: memref<3x108x128xbf16, #tpu.memory_space<vmem>>, %arg3: memref<1x128xf32, #tpu.memory_space<vmem>>, %arg4: memref<1x256x32xf32, #tpu.memory_space<vmem>>, %arg5: memref<1x256x128xf32, #tpu.memory_space<vmem>>) attributes {dimension_semantics = [#tpu.dimension_semantics<parallel>], iteration_bounds = array<i64: 2>, scalar_prefetch = 0 : i64, scratch_operands = 0 : i64, tpu.core_type = #tpu.core_type<tc>, window_params = [{transform_indices = @transform_0, window_bounds = array<i64: 1, 18, 16, 108>}, {pipeline_mode = #tpu.pipeline_mode<synchronous>, transform_indices = @transform_1, window_bounds = array<i64: 3, 108, 128>}, {pipeline_mode = #tpu.pipeline_mode<synchronous>, transform_indices = @transform_2, window_bounds = array<i64: 1, 128>}, {transform_indices = @transform_3, window_bounds = array<i64: 1, 256, 32>}, {transform_indices = @transform_4, window_bounds = array<i64: 1, 256, 128>}]} {
    %c0 = arith.constant 0 : index
    %c0_0 = arith.constant 0 : index
    %c0_1 = arith.constant 0 : index
    %c0_2 = arith.constant 0 : index
    %0 = vector.load %arg1[%c0, %c0_0, %c0_1, %c0_2] : memref<1x18x16x108xbf16, #tpu.memory_space<vmem>>, vector<1x8x16x108xbf16>
    %1 = vector.shape_cast %0 : vector<1x8x16x108xbf16> to vector<8x16x108xbf16>
    %2 = vector.shape_cast %1 : vector<8x16x108xbf16> to vector<128x108xbf16>
    %c0_3 = arith.constant 0 : index
    %c0_4 = arith.constant 0 : index
    %c0_5 = arith.constant 0 : index
    %3 = vector.load %arg2[%c0_3, %c0_4, %c0_5] : memref<3x108x128xbf16, #tpu.memory_space<vmem>>, vector<1x108x128xbf16>
    %4 = vector.shape_cast %3 : vector<1x108x128xbf16> to vector<108x128xbf16>
    %cst = arith.constant dense<0.000000e+00> : vector<128x128xf32>
    %5 = tpu.matmul %2, %4, %cst {dimension_numbers = #tpu.dot_dimension_numbers<[1], [0], [0], [1], [0, 0, 1, 1], [], []>} : vector<128x108xbf16>, vector<108x128xbf16>, vector<128x128xf32> -> vector<128x128xf32>
    %c0_6 = arith.constant 0 : index
    %c1 = arith.constant 1 : index
    %c0_7 = arith.constant 0 : index
    %c0_8 = arith.constant 0 : index
    %6 = vector.load %arg1[%c0_6, %c1, %c0_7, %c0_8] : memref<1x18x16x108xbf16, #tpu.memory_space<vmem>>, vector<1x8x16x108xbf16>
    %7 = vector.shape_cast %6 : vector<1x8x16x108xbf16> to vector<8x16x108xbf16>
    %8 = vector.shape_cast %7 : vector<8x16x108xbf16> to vector<128x108xbf16>
    %c1_9 = arith.constant 1 : index
    %c0_10 = arith.constant 0 : index
    %c0_11 = arith.constant 0 : index
    %9 = vector.load %arg2[%c1_9, %c0_10, %c0_11] : memref<3x108x128xbf16, #tpu.memory_space<vmem>>, vector<1x108x128xbf16>
    %10 = vector.shape_cast %9 : vector<1x108x128xbf16> to vector<108x128xbf16>
    %cst_12 = arith.constant dense<0.000000e+00> : vector<128x128xf32>
    %11 = tpu.matmul %8, %10, %cst_12 {dimension_numbers = #tpu.dot_dimension_numbers<[1], [0], [0], [1], [0, 0, 1, 1], [], []>} : vector<128x108xbf16>, vector<108x128xbf16>, vector<128x128xf32> -> vector<128x128xf32>
    %12 = arith.addf %5, %11 : vector<128x128xf32>
    %c0_13 = arith.constant 0 : index
    %c2 = arith.constant 2 : index
    %c0_14 = arith.constant 0 : index
    %c0_15 = arith.constant 0 : index
    %13 = vector.load %arg1[%c0_13, %c2, %c0_14, %c0_15] : memref<1x18x16x108xbf16, #tpu.memory_space<vmem>>, vector<1x8x16x108xbf16>
    %14 = vector.shape_cast %13 : vector<1x8x16x108xbf16> to vector<8x16x108xbf16>
    %15 = vector.shape_cast %14 : vector<8x16x108xbf16> to vector<128x108xbf16>
    %c2_16 = arith.constant 2 : index
    %c0_17 = arith.constant 0 : index
    %c0_18 = arith.constant 0 : index
    %16 = vector.load %arg2[%c2_16, %c0_17, %c0_18] : memref<3x108x128xbf16, #tpu.memory_space<vmem>>, vector<1x108x128xbf16>
    %17 = vector.shape_cast %16 : vector<1x108x128xbf16> to vector<108x128xbf16>
    %cst_19 = arith.constant dense<0.000000e+00> : vector<128x128xf32>
    %18 = tpu.matmul %15, %17, %cst_19 {dimension_numbers = #tpu.dot_dimension_numbers<[1], [0], [0], [1], [0, 0, 1, 1], [], []>} : vector<128x108xbf16>, vector<108x128xbf16>, vector<128x128xf32> -> vector<128x128xf32>
    %19 = arith.addf %12, %18 : vector<128x128xf32>
    %c0_20 = arith.constant 0 : index
    %c0_21 = arith.constant 0 : index
    %20 = vector.load %arg3[%c0_20, %c0_21] : memref<1x128xf32, #tpu.memory_space<vmem>>, vector<1x128xf32>
    %21 = vector.broadcast %20 : vector<1x128xf32> to vector<128x128xf32>
    %22 = arith.addf %19, %21 : vector<128x128xf32>
    %23 = arith.negf %22 : vector<128x128xf32>
    %24 = math.exp %23 : vector<128x128xf32>
    %cst_22 = arith.constant 1.000000e+00 : f32
    %25 = vector.broadcast %cst_22 : f32 to vector<128x128xf32>
    %26 = arith.addf %25, %24 : vector<128x128xf32>
    %27 = arith.divf %25, %26 : vector<128x128xf32>
    %28 = vector.extract_strided_slice %27 {offsets = [0, 0], sizes = [128, 32], strides = [1, 1]} : vector<128x128xf32> to vector<128x32xf32>
    %29 = vector.extract_strided_slice %27 {offsets = [0, 32], sizes = [128, 32], strides = [1, 1]} : vector<128x128xf32> to vector<128x32xf32>
    %30 = vector.extract_strided_slice %27 {offsets = [0, 64], sizes = [128, 32], strides = [1, 1]} : vector<128x128xf32> to vector<128x32xf32>
    %31 = vector.extract_strided_slice %22 {offsets = [0, 96], sizes = [128, 32], strides = [1, 1]} : vector<128x128xf32> to vector<128x32xf32>
    %32 = math.tanh %31 : vector<128x32xf32>
    %c0_23 = arith.constant 0 : index
    %c0_24 = arith.constant 0 : index
    %c0_25 = arith.constant 0 : index
    %33 = vector.load %arg4[%c0_23, %c0_24, %c0_25] : memref<1x256x32xf32, #tpu.memory_space<vmem>>, vector<1x128x32xf32>
    %34 = vector.shape_cast %33 : vector<1x128x32xf32> to vector<128x32xf32>
    %35 = arith.mulf %29, %34 : vector<128x32xf32>
    %36 = arith.mulf %28, %32 : vector<128x32xf32>
    %37 = arith.addf %35, %36 : vector<128x32xf32>
    %38 = math.tanh %37 : vector<128x32xf32>
    %39 = arith.mulf %30, %38 : vector<128x32xf32>
    %cst_26 = arith.constant 0.000000e+00 : f32
    %40 = vector.broadcast %cst_26 : f32 to vector<128x64xf32>
    %41 = tpu.concatenate %39, %37, %40 in 1 : vector<128x32xf32>, vector<128x32xf32>, vector<128x64xf32> -> vector<128x128xf32>
    %c0_27 = arith.constant 0 : index
    %c0_28 = arith.constant 0 : index
    %c0_29 = arith.constant 0 : index
    %42 = vector.load %arg5[%c0_27, %c0_28, %c0_29] : memref<1x256x128xf32, #tpu.memory_space<vmem>>, vector<1x128x128xf32>
    %43 = vector.shape_cast %42 : vector<1x128x128xf32> to vector<128x128xf32>
    %44 = vector.shape_cast %41 : vector<128x128xf32> to vector<1x128x128xf32>
    tpu.vector_store %arg5[%c0_27, %c0_28, %c0_29], %44 {strides = array<i32>} : memref<1x256x128xf32, #tpu.memory_space<vmem>>, vector<1x128x128xf32>,
    %c0_30 = arith.constant 0 : index
    %c8 = arith.constant 8 : index
    %c0_31 = arith.constant 0 : index
    %c0_32 = arith.constant 0 : index
    %45 = vector.load %arg1[%c0_30, %c8, %c0_31, %c0_32] : memref<1x18x16x108xbf16, #tpu.memory_space<vmem>>, vector<1x8x16x108xbf16>
    %46 = vector.shape_cast %45 : vector<1x8x16x108xbf16> to vector<8x16x108xbf16>
    %47 = vector.shape_cast %46 : vector<8x16x108xbf16> to vector<128x108xbf16>
    %c0_33 = arith.constant 0 : index
    %c0_34 = arith.constant 0 : index
    %c0_35 = arith.constant 0 : index
    %48 = vector.load %arg2[%c0_33, %c0_34, %c0_35] : memref<3x108x128xbf16, #tpu.memory_space<vmem>>, vector<1x108x128xbf16>
    %49 = vector.shape_cast %48 : vector<1x108x128xbf16> to vector<108x128xbf16>
    %cst_36 = arith.constant dense<0.000000e+00> : vector<128x128xf32>
    %50 = tpu.matmul %47, %49, %cst_36 {dimension_numbers = #tpu.dot_dimension_numbers<[1], [0], [0], [1], [0, 0, 1, 1], [], []>} : vector<128x108xbf16>, vector<108x128xbf16>, vector<128x128xf32> -> vector<128x128xf32>
    %c0_37 = arith.constant 0 : index
    %c9 = arith.constant 9 : index
    %c0_38 = arith.constant 0 : index
    %c0_39 = arith.constant 0 : index
    %51 = vector.load %arg1[%c0_37, %c9, %c0_38, %c0_39] : memref<1x18x16x108xbf16, #tpu.memory_space<vmem>>, vector<1x8x16x108xbf16>
    %52 = vector.shape_cast %51 : vector<1x8x16x108xbf16> to vector<8x16x108xbf16>
    %53 = vector.shape_cast %52 : vector<8x16x108xbf16> to vector<128x108xbf16>
    %c1_40 = arith.constant 1 : index
    %c0_41 = arith.constant 0 : index
    %c0_42 = arith.constant 0 : index
    %54 = vector.load %arg2[%c1_40, %c0_41, %c0_42] : memref<3x108x128xbf16, #tpu.memory_space<vmem>>, vector<1x108x128xbf16>
    %55 = vector.shape_cast %54 : vector<1x108x128xbf16> to vector<108x128xbf16>
    %cst_43 = arith.constant dense<0.000000e+00> : vector<128x128xf32>
    %56 = tpu.matmul %53, %55, %cst_43 {dimension_numbers = #tpu.dot_dimension_numbers<[1], [0], [0], [1], [0, 0, 1, 1], [], []>} : vector<128x108xbf16>, vector<108x128xbf16>, vector<128x128xf32> -> vector<128x128xf32>
    %57 = arith.addf %50, %56 : vector<128x128xf32>
    %c0_44 = arith.constant 0 : index
    %c10 = arith.constant 10 : index
    %c0_45 = arith.constant 0 : index
    %c0_46 = arith.constant 0 : index
    %58 = vector.load %arg1[%c0_44, %c10, %c0_45, %c0_46] : memref<1x18x16x108xbf16, #tpu.memory_space<vmem>>, vector<1x8x16x108xbf16>
    %59 = vector.shape_cast %58 : vector<1x8x16x108xbf16> to vector<8x16x108xbf16>
    %60 = vector.shape_cast %59 : vector<8x16x108xbf16> to vector<128x108xbf16>
    %c2_47 = arith.constant 2 : index
    %c0_48 = arith.constant 0 : index
    %c0_49 = arith.constant 0 : index
    %61 = vector.load %arg2[%c2_47, %c0_48, %c0_49] : memref<3x108x128xbf16, #tpu.memory_space<vmem>>, vector<1x108x128xbf16>
    %62 = vector.shape_cast %61 : vector<1x108x128xbf16> to vector<108x128xbf16>
    %cst_50 = arith.constant dense<0.000000e+00> : vector<128x128xf32>
    %63 = tpu.matmul %60, %62, %cst_50 {dimension_numbers = #tpu.dot_dimension_numbers<[1], [0], [0], [1], [0, 0, 1, 1], [], []>} : vector<128x108xbf16>, vector<108x128xbf16>, vector<128x128xf32> -> vector<128x128xf32>
    %64 = arith.addf %57, %63 : vector<128x128xf32>
    %c0_51 = arith.constant 0 : index
    %c0_52 = arith.constant 0 : index
    %65 = vector.load %arg3[%c0_51, %c0_52] : memref<1x128xf32, #tpu.memory_space<vmem>>, vector<1x128xf32>
    %66 = vector.broadcast %65 : vector<1x128xf32> to vector<128x128xf32>
    %67 = arith.addf %64, %66 : vector<128x128xf32>
    %68 = arith.negf %67 : vector<128x128xf32>
    %69 = math.exp %68 : vector<128x128xf32>
    %cst_53 = arith.constant 1.000000e+00 : f32
    %70 = vector.broadcast %cst_53 : f32 to vector<128x128xf32>
    %71 = arith.addf %70, %69 : vector<128x128xf32>
    %72 = arith.divf %70, %71 : vector<128x128xf32>
    %73 = vector.extract_strided_slice %72 {offsets = [0, 0], sizes = [128, 32], strides = [1, 1]} : vector<128x128xf32> to vector<128x32xf32>
    %74 = vector.extract_strided_slice %72 {offsets = [0, 32], sizes = [128, 32], strides = [1, 1]} : vector<128x128xf32> to vector<128x32xf32>
    %75 = vector.extract_strided_slice %72 {offsets = [0, 64], sizes = [128, 32], strides = [1, 1]} : vector<128x128xf32> to vector<128x32xf32>
    %76 = vector.extract_strided_slice %67 {offsets = [0, 96], sizes = [128, 32], strides = [1, 1]} : vector<128x128xf32> to vector<128x32xf32>
    %77 = math.tanh %76 : vector<128x32xf32>
    %c0_54 = arith.constant 0 : index
    %c128 = arith.constant 128 : index
    %c0_55 = arith.constant 0 : index
    %78 = vector.load %arg4[%c0_54, %c128, %c0_55] : memref<1x256x32xf32, #tpu.memory_space<vmem>>, vector<1x128x32xf32>
    %79 = vector.shape_cast %78 : vector<1x128x32xf32> to vector<128x32xf32>
    %80 = arith.mulf %74, %79 : vector<128x32xf32>
    %81 = arith.mulf %73, %77 : vector<128x32xf32>
    %82 = arith.addf %80, %81 : vector<128x32xf32>
    %83 = math.tanh %82 : vector<128x32xf32>
    %84 = arith.mulf %75, %83 : vector<128x32xf32>
    %cst_56 = arith.constant 0.000000e+00 : f32
    %85 = vector.broadcast %cst_56 : f32 to vector<128x64xf32>
    %86 = tpu.concatenate %84, %82, %85 in 1 : vector<128x32xf32>, vector<128x32xf32>, vector<128x64xf32> -> vector<128x128xf32>
    %c0_57 = arith.constant 0 : index
    %c128_58 = arith.constant 128 : index
    %c0_59 = arith.constant 0 : index
    %87 = vector.load %arg5[%c0_57, %c128_58, %c0_59] : memref<1x256x128xf32, #tpu.memory_space<vmem>>, vector<1x128x128xf32>
    %88 = vector.shape_cast %87 : vector<1x128x128xf32> to vector<128x128xf32>
    %89 = vector.shape_cast %86 : vector<128x128xf32> to vector<1x128x128xf32>
    tpu.vector_store %arg5[%c0_57, %c128_58, %c0_59], %89 {strides = array<i32>} : memref<1x256x128xf32, #tpu.memory_space<vmem>>, vector<1x128x128xf32>,
    return
  }
  func.func @transform_0(%arg0: i32) -> (i32, i32, i32, i32) {
    %c0_i32 = arith.constant 0 : i32
    %c0_i32_0 = arith.constant 0 : i32
    %c0_i32_1 = arith.constant 0 : i32
    %c0_i32_2 = arith.constant 0 : i32
    return %arg0, %c0_i32, %c0_i32_0, %c0_i32_1 : i32, i32, i32, i32
  }
  func.func @transform_1(%arg0: i32) -> (i32, i32, i32) {
    %c0_i32 = arith.constant 0 : i32
    %c0_i32_0 = arith.constant 0 : i32
    %c0_i32_1 = arith.constant 0 : i32
    %c0_i32_2 = arith.constant 0 : i32
    return %c0_i32, %c0_i32_0, %c0_i32_1 : i32, i32, i32
  }
  func.func @transform_2(%arg0: i32) -> (i32, i32) {
    %c0_i32 = arith.constant 0 : i32
    %c0_i32_0 = arith.constant 0 : i32
    %c0_i32_1 = arith.constant 0 : i32
    return %c0_i32, %c0_i32_0 : i32, i32
  }
  func.func @transform_3(%arg0: i32) -> (i32, i32, i32) {
    %c0_i32 = arith.constant 0 : i32
    %c0_i32_0 = arith.constant 0 : i32
    %c0_i32_1 = arith.constant 0 : i32
    return %arg0, %c0_i32, %c0_i32_0 : i32, i32, i32
  }
  func.func @transform_4(%arg0: i32) -> (i32, i32, i32) {
    %c0_i32 = arith.constant 0 : i32
    %c0_i32_0 = arith.constant 0 : i32
    %c0_i32_1 = arith.constant 0 : i32
    return %arg0, %c0_i32, %c0_i32_0 : i32, i32, i32
  }
}

</mosaic_0001>

<bundles_post_ra>
// kernel: tpu_custom_call.1
= control target key start
LH: loop header
LB: loop body
LE: loop exit
PB: predicated region body
PF: predicated region fallthrough
CT: control target
= control target key end

     0   :  { %9 = vsyncpa [#allocation3], 0  ;;  %s6245_s0 = inlined_call_operand.vmem [shape: bf16[2,18,16,108], index: 0, kind: input, shape index: {}]   ;;  %s6246_s1 = inlined_call_operand.vmem [shape: bf16[3,108,128], index: 1, kind: input, shape index: {}]   ;;  %s6247_s2 = inlined_call_operand.vmem [shape: f32[1,128], index: 2, kind: input, shape index: {}]   ;;  %s6248_s3 = inlined_call_operand.vmem [shape: f32[2,256,32], index: 3, kind: input, shape index: {}]   ;;  %s6249_s4 = inlined_call_operand.hbm [shape: f32[2,256,128], index: 4, kind: output, shape index: {}]  }
   0x1   :  { %11 = vsyncpa [#allocation3 + $0x1], 0  ;;  %s4170_s15 = smov 0   ;;  %s4172_s16 = smov 0  }
   0x2   :  { %s4174_s17 = smov 0   ;;  %s4176_s18 = smov 0  }
   0x3 LB: > { %s4191_s19 = sadd.s32 4294967295, %s4139_s18   ;;  %s3080_s20 = sadd.s32 4294967294, %s4139_s18   ;;  %s4139_s18 = sphi %s4176_s18, %s6430_s18   ;;  %s4135_s17 = sphi %s4174_s17, %s6429_s17   ;;  %s4131_s16 = sphi %s4172_s16, %s6428_s16   ;;  %s4127_s15 = sphi %s4170_s15, %s6427_s15  }
   0x4   : > { %s4195_s21 = sadd.s32 1, %s4139_s18   ;;  %s118_s22 = sadd.s32 1, %s4135_s17 }
   0x5   : > { %s115_s23 = ssub.s32 %s4139_s18, %s4195_s21  ;;  %p128_p0 = scmp.ne.s32.totalorder %s4135_s17, %s4131_s16 }
   0x6   : > { %p116_p1 = scmp.eq.s32.totalorder %s115_s23, 0  ;;  %p129_p2 = scmp.eq.s32.totalorder %s4191_s19, 1 }
   0x7   : > { %p134_p3 = scmp.ne.s32.totalorder %s4131_s16, %s4127_s15  ;;  %p135_p4 = scmp.eq.s32.totalorder %s3080_s20, 1 }
   0x8   : > { %s4206_s24 = scalar_select %p116_p1, %s4135_s17, %s118_s22  }
   0x9   : > { %p4208_p5 = por %p129_p2, %p128_p0  ;;  %p4212_p6 = por %p135_p4, %p134_p3 }
   0xa   : > { %p3083_p7 = scmp.ge.s32.totalorder %s4139_s18, 1  ;;  %p175_p8 = scmp.lt.s32.totalorder %s4139_s18, 3 }
   0xc   : > { %p176_p9 = pnand %p3083_p7, %p175_p8 }
   0xe   : > { %179 = sbr.rel (%p176_p9) target bundleno = 859 (0x35b), region = 36 }
  0x13   : > { %v3176_v0 = vld [vmem:[%s6246_s1 + $0x68] sm:$0xf]  ;;  %v3699_v1 = vld [vmem:[%s6246_s1 + $0x68] sm:$0x30]  ;;  %vm385_vm0 = vcmask 1045504   ;;  %v3698_v8 = vld [vmem:[%s6246_s1 + $0x60] sm:$0xff] }
  0x14   : > { %v3177_v2 = vor.u32 %v3699_v1, %v3176_v0  ;;  %v3244_v3 = vld [vmem:[%s6246_s1 + $0x30] sm:$0xf]  ;;  %v3684_v4 = vld [vmem:[%s6246_s1 + $0x30] sm:$0x30]  ;;  %v3683_v9 = vld [vmem:[%s6246_s1 + $0x28] sm:$0xff]  ;;  %p206_p10 = scmp.lt.s32.totalorder %s4191_s19, 1 }
  0x15   : > { %v3245_v5 = vor.u32 %v3684_v4, %v3244_v3  ;;  %v3697_v10 = vld [vmem:[%s6246_s1 + $0x58] sm:$0xff]  ;;  %v3682_v11 = vld [vmem:[%s6246_s1 + $0x20] sm:$0xff]  ;;  %v3696_v12 = vld [vmem:[%s6246_s1 + $0x50] sm:$0xff]  ;;  %vm360_vm1 = vcmask 883712   ;;  %s4142_s22 = smov 64   ;;  %s203_s23 = sand.u32 1, %s4131_s16  }
  0x16   : > { %v387_v6 = vsel %vm385_vm0, %v3177_v2, 0  ;;  %v3681_v13 = vld [vmem:[%s6246_s1 + $0x18] sm:$0xff]  ;;  %s4252_s30 = scalar_select %p206_p10, %s4191_s19, 1  ;;  %v3695_v14 = vld [vmem:[%s6246_s1 + $0x48] sm:$0xff]  ;;  %v3680_v15 = vld [vmem:[%s6246_s1 + $0x10] sm:$0xff] }
  0x17   : > { %390 = vmatpush.bf16.msra.mxu0 %v387_v6  ;;  %3761 = vmatpush.bf16.msra.mxu2 %v387_v6  ;;  %v544_v7 = vsel %vm385_vm0, %v3245_v5, 0  ;;  %v3694_v16 = vld [vmem:[%s6246_s1 + $0x40] sm:$0xff]  ;;  %v3472_v17 = vld [vmem:[%s6246_s1 + $0x68] sm:$0xf]  ;;  %v3744_v18 = vld [vmem:[%s6246_s1 + $0x68] sm:$0x30] }
  0x18   : > { %547 = vmatpush.bf16.msra.mxu1 %v544_v7  ;;  %3768 = vmatpush.bf16.msra.mxu3 %v544_v7  ;;  %s3775_s11 = smul.u32 144, %s4252_s30  ;;  %v3540_v19 = vld [vmem:[%s6246_s1 + $0x30] sm:$0xf]  ;;  %v3729_v20 = vld [vmem:[%s6246_s1 + $0x30] sm:$0x30]  ;;  %v3679_v21 = vld [vmem:[%s6246_s1 + $0x8] sm:$0xff]  ;;  %v3473_v23 = vor.u32 %v3744_v18, %v3472_v17 }
  0x19   : > { %v3342_v22 = vld [vmem:[%s6246_s1 + $0xa0] sm:$0xf]  ;;  %v3541_v24 = vor.u32 %v3729_v20, %v3540_v19  ;;  %v3714_v25 = vld [vmem:[%s6246_s1 + $0xa0] sm:$0x30]  ;;  %v3693_v28 = vld [vmem:[%s6246_s1 + $0x38] sm:$0xff]  ;;  %s3669_s8 = sshll.u32 %s4252_s30, 8 }
  0x1a   : > { %v3638_v26 = vld [vmem:[%s6246_s1 + $0xa0] sm:$0xf]  ;;  %v3759_v27 = vld [vmem:[%s6246_s1 + $0xa0] sm:$0x30]  ;;  %s4297_s28 = scalar_lea.vmem %s6245_s0, %s3775_s11  ;;  %v3343_v30 = vor.u32 %v3714_v25, %v3342_v22  ;;  %v1774_v34 = vsel %vm385_vm0, %v3473_v23, 0  ;;  %v3728_v41 = vld [vmem:[%s6246_s1 + $0x28] sm:$0xff]  ;;  %s4402_s12 = scalar_lea.vmem %s6248_s3, %s3669_s8 }
  0x1b   : > { %391 = vmatpush.bf16.msra.mxu0 %v3698_v8  ;;  %3762 = vmatpush.bf16.msra.mxu2 %v3698_v8  ;;  %v3678_v29 = vld [vmem:[%s6246_s1] sm:$0xff]  ;;  %v3639_v31 = vor.u32 %v3759_v27, %v3638_v26  ;;  %v3685_v32 = vld [vmem:[%s4297_s28 + $0x8] sm:$0xff]  ;;  %v1931_v35 = vsel %vm385_vm0, %v3541_v24, 0  ;;  %v3713_v42 = vld [vmem:[%s6246_s1 + $0x98] sm:$0xff]  ;;  %s4141_s30 = smov 32   ;;  %s3084_s27 = sshll.u32 %s203_s23, 8 }
  0x1c   : > { %548 = vmatpush.bf16.msra.mxu1 %v3683_v9  ;;  %3769 = vmatpush.bf16.msra.mxu3 %v3683_v9  ;;  %v3689_v33 = vld [vmem:[%s4297_s28 + $0x28] sm:$0xff]  ;;  %v3670_v36 = vld [vmem:[%s4297_s28] sm:$0xff]  ;;  %v733_v38 = vsel %vm385_vm0, %v3343_v30, 0  ;;  %v3758_v43 = vld [vmem:[%s6246_s1 + $0x98] sm:$0xff]  ;;  %s6079_s29 = scalar_lea.vmem [#allocation2], %s3084_s27  ;;  %s3760_s5 = sshll.u32 %s4191_s19, 8 }
  0x1d   : > { %v3674_v37 = vld [vmem:[%s4297_s28 + $0x20] sm:$0xff]  ;;  %v2119_v39 = vsel %vm385_vm0, %v3639_v31, 0  ;;  %v3742_v44 = vld [vmem:[%s6246_s1 + $0x58] sm:$0xff]  ;;  %v3712_v46 = vld [vmem:[%s6246_s1 + $0x90] sm:$0xff]  ;;  %s3002_s7 = scalar_lea.hbm %s6249_s4, %s3760_s5  ;;  %s3003_s8 = sshll.u32 %s6079_s29, 4  ;;  %s3004_s8 = int_to_ptr.vmem [resolvable:$true] %s3003_s8 }
  0x1e   : > { %v3743_v40 = vld [vmem:[%s6246_s1 + $0x60] sm:$0xff]  ;;  %v3757_v47 = vld [vmem:[%s6246_s1 + $0x90] sm:$0xff]  ;;  %v3726_v49 = vld [vmem:[%s6246_s1 + $0x18] sm:$0xff]  ;;  %s3005_s9 = sshll.u32 %s3002_s7, 4  ;;  %s2991_s19 = scalar_lea.sflag [#allocation3], %s203_s23  ;;  %s3006_s9 = int_to_ptr.hbm [resolvable:$true] %s3005_s9 }
  0x1f   : > { %392 = vmatpush.bf16.msra.mxu0 %v3697_v10  ;;  %3763 = vmatpush.bf16.msra.mxu2 %v3697_v10  ;;  %v3727_v45 = vld [vmem:[%s6246_s1 + $0x20] sm:$0xff]  ;;  %v3741_v48 = vld [vmem:[%s6246_s1 + $0x50] sm:$0xff]  ;;  %v3711_v50 = vld [vmem:[%s6246_s1 + $0x88] sm:$0xff]  ;;  %s4091_s10 = sshra.s32 %s3006_s9, 4  ;;  %s4097_s13 = scalar_lea.hbm %s6249_s4, 512  ;;  %s4092_s10 = int_to_ptr.hbm [resolvable:$true] %s4091_s10 }
  0x20   : > { %549 = vmatpush.bf16.msra.mxu1 %v3682_v11  ;;  %3770 = vmatpush.bf16.msra.mxu3 %v3682_v11  ;;  %v3756_v51 = vld [vmem:[%s6246_s1 + $0x88] sm:$0xff]  ;;  %v3725_v53 = vld [vmem:[%s6246_s1 + $0x10] sm:$0xff]  ;;  %v3710_v58 = vld [vmem:[%s6246_s1 + $0x80] sm:$0xff]  ;;  %p4098_p0 = scmp.lt.s32.totalorder %s4092_s10, %s6249_s4 }
  0x21   : > { %v3740_v52 = vld [vmem:[%s6246_s1 + $0x48] sm:$0xff]  ;;  %v3686_v54 = vld [vmem:[%s4297_s28 + $0x10] sm:$0xff]  ;;  %v3755_v59 = vld [vmem:[%s6246_s1 + $0x80] sm:$0xff] }
  0x22   : > { %v3690_v55 = vld [vmem:[%s4297_s28 + $0x30] sm:$0xff]  ;;  %v3671_v56 = vld [vmem:[%s4297_s28 + $0x8] sm:$0xff]  ;;  %v3739_v60 = vld [vmem:[%s6246_s1 + $0x40] sm:$0xff] }
  0x23   : > { %393 = vmatpush.bf16.msra.mxu0 %v3696_v12  ;;  %3764 = vmatpush.bf16.msra.mxu2 %v3696_v12  ;;  %v3675_v57 = vld [vmem:[%s4297_s28 + $0x28] sm:$0xff]  ;;  %v3709_v62 = vld [vmem:[%s6246_s1 + $0x78] sm:$0xff]  ;;  %v3723_v1 = vld [vmem:[%s6246_s1] sm:$0xff] }
  0x24   : > { %550 = vmatpush.bf16.msra.mxu1 %v3681_v13  ;;  %3771 = vmatpush.bf16.msra.mxu3 %v3681_v13  ;;  %v3724_v61 = vld [vmem:[%s6246_s1 + $0x8] sm:$0xff]  ;;  %v3754_v63 = vld [vmem:[%s6246_s1 + $0x78] sm:$0xff]  ;;  %v3708_v2 = vld [vmem:[%s6246_s1 + $0x70] sm:$0xff] }
  0x25   : > { %v3738_v0 = vld [vmem:[%s6246_s1 + $0x38] sm:$0xff]  ;;  %v3753_v3 = vld [vmem:[%s6246_s1 + $0x70] sm:$0xff]  ;;  %v1140_v8 = vld [vmem:[%s4402_s12] sm:$0xff] }
  0x26   : > { %v3687_v4 = vld [vmem:[%s4297_s28 + $0x18] sm:$0xff]  ;;  %v3672_v6 = vld [vmem:[%s4297_s28 + $0x10] sm:$0xff]  ;;  %1172 = vrot.lane.b32.xlu0 %v1140_v8, %s4141_s30  ;;  %v3688_v9 = vld [vmem:[%s4297_s28 + $0x20] sm:$0xff] }
  0x27   : > { %394 = vmatpush.bf16.msra.mxu0 %v3695_v14  ;;  %3765 = vmatpush.bf16.msra.mxu2 %v3695_v14  ;;  %v3691_v5 = vld [vmem:[%s4297_s28 + $0x38] sm:$0xff]  ;;  %v3676_v7 = vld [vmem:[%s4297_s28 + $0x30] sm:$0xff]  ;;  %v3692_v10 = vld [vmem:[%s4297_s28 + $0x40] sm:$0xff] }
  0x28   : > { %551 = vmatpush.bf16.msra.mxu1 %v3680_v15  ;;  %3772 = vmatpush.bf16.msra.mxu3 %v3680_v15  ;;  %v3673_v11 = vld [vmem:[%s4297_s28 + $0x18] sm:$0xff]  ;;  %v1141_v13 = vld [vmem:[%s4402_s12 + $0x8] sm:$0xff]  ;;  %v1142_v14 = vld [vmem:[%s4402_s12 + $0x10] sm:$0xff] }
  0x29   : > { %v3677_v12 = vld [vmem:[%s4297_s28 + $0x38] sm:$0xff]  ;;  %1176 = vrot.lane.b32.xlu1 %v1142_v14, %s4141_s30  ;;  %v1146_v15 = vld [vmem:[%s4402_s12 + $0x30] sm:$0xff]  ;;  %v3715_v17 = vld [vmem:[%s4297_s28 + $0x40] sm:$0xff] }
  0x2a   : > { %v3730_v18 = vld [vmem:[%s4297_s28 + $0x48] sm:$0xff]  ;;  %v3745_v19 = vld [vmem:[%s4297_s28 + $0x50] sm:$0xff]  ;;  %v1144_v20 = vld [vmem:[%s4402_s12 + $0x20] sm:$0xff] }
  0x2b   : > { %395 = vmatpush.bf16.msra.mxu0 %v3694_v16  ;;  %3766 = vmatpush.bf16.msra.mxu2 %v3694_v16  ;;  %v3700_v16 = vld [vmem:[%s4297_s28 + $0x10] sm:$0xff]  ;;  %v1149_v22 = vld [vmem:[%s4402_s12 + $0x48] sm:$0xff]  ;;  %v1147_v24 = vld [vmem:[%s4402_s12 + $0x38] sm:$0xff] }
  0x2c   : > { %552 = vmatpush.bf16.msra.mxu1 %v3679_v21  ;;  %3773 = vmatpush.bf16.msra.mxu3 %v3679_v21  ;;  %v1143_v21 = vld [vmem:[%s4402_s12 + $0x18] sm:$0xff]  ;;  %v1145_v23 = vld [vmem:[%s4402_s12 + $0x28] sm:$0xff]  ;;  %v1152_v25 = vld [vmem:[%s4402_s12 + $0x60] sm:$0xff] }
  0x2d   : > { %1180 = vrot.lane.b32.xlu2 %v1144_v20, %s4141_s30  ;;  %v3701_v26 = vld [vmem:[%s4297_s28 + $0x18] sm:$0xff]  ;;  %v3716_v27 = vld [vmem:[%s4297_s28 + $0x48] sm:$0xff]  ;;  %v1148_v30 = vld [vmem:[%s4402_s12 + $0x40] sm:$0xff] }
  0x2e   : > { %1174 = vrot.lane.b32.xlu0 %v1141_v13, %s4141_s30  ;;  %v1150_v31 = vld [vmem:[%s4402_s12 + $0x50] sm:$0xff]  ;;  %v3736_v20 = vld [vmem:[%s4297_s28 + $0x78] sm:$0xff] }
  0x2f   : > { %396 = vmatpush.bf16.msra.mxu0 %v3693_v28  ;;  %3767 = vmatpush.bf16.msra.mxu2 %v3693_v28  ;;  %v3731_v28 = vld [vmem:[%s4297_s28 + $0x50] sm:$0xff] }
  0x30   : > { %553 = vmatpush.bf16.msra.mxu1 %v3678_v29  ;;  %3774 = vmatpush.bf16.msra.mxu3 %v3678_v29  ;;  %v3746_v29 = vld [vmem:[%s4297_s28 + $0x58] sm:$0xff]  ;;  %v2532_v13 = vld [vmem:[%s4402_s12 + $0xb0] sm:$0xff] }
  0x31   : > { %1178 = vrot.lane.b32.xlu1 %v1143_v21, %s4141_s30  ;;  %v3751_v21 = vld [vmem:[%s4297_s28 + $0x80] sm:$0xff] }
  0x32   : > { %3178 = vmatmul.msk.bf16.vlgmr.msra.gmra.mxu0 %vm360_vm1, %v3685_v32  ;;  %3182 = vmatmul.msk.bf16.vlgmr.msra.gmra.mxu2 %vm360_vm1, %v3689_v33  ;;  %v1155_v32 = vld [vmem:[%s4402_s12 + $0x78] sm:$0xff] }
  0x33   : > { %1934 = vmatpush.bf16.msrb.mxu0 %v1931_v35  ;;  %3246 = vmatmul.msk.bf16.vlgmr.msra.gmra.mxu1 %vm360_vm1, %v3670_v36  ;;  %v1151_v33 = vld [vmem:[%s4402_s12 + $0x58] sm:$0xff]  ;;  %v2527_v35 = vld [vmem:[%s4402_s12 + $0x88] sm:$0xff]  ;;  %v3702_v36 = vld [vmem:[%s4297_s28 + $0x20] sm:$0xff] }
  0x34   : > { %1777 = vmatpush.bf16.msrb.mxu3 %v1774_v34  ;;  %736 = vmatpush.bf16.msrb.mxu2 %v733_v38  ;;  %v1153_v34 = vld [vmem:[%s4402_s12 + $0x68] sm:$0xff]  ;;  %v3732_v38 = vld [vmem:[%s4297_s28 + $0x58] sm:$0xff] }
  0x35   : > { %3250 = vmatmul.msk.bf16.vlgmr.msra.gmra.mxu3 %vm360_vm1, %v3674_v37  ;;  %2122 = vmatpush.bf16.msrb.mxu1 %v2119_v39  ;;  %v3717_v37 = vld [vmem:[%s4297_s28 + $0x50] sm:$0xff]  ;;  %v3747_v39 = vld [vmem:[%s4297_s28 + $0x60] sm:$0xff] }
  0x36   : > { %1184 = vrot.lane.b32.xlu0 %v1146_v15, %s4141_s30  ;;  %1182 = vrot.lane.b32.xlu2 %v1145_v23, %s4141_s30  ;;  %v2537_v23 = vld [vmem:[%s4402_s12 + $0xd8] sm:$0xff] }
  0x37   : > { %1935 = vmatpush.bf16.msrb.mxu0 %v3728_v41  ;;  %v2528_v41 = vld [vmem:[%s4402_s12 + $0x90] sm:$0xff] }
  0x38   : > { %1778 = vmatpush.bf16.msrb.mxu3 %v3743_v40  ;;  %737 = vmatpush.bf16.msrb.mxu2 %v3713_v42  ;;  %v1154_v40 = vld [vmem:[%s4402_s12 + $0x70] sm:$0xff]  ;;  %v2526_v42 = vld [vmem:[%s4402_s12 + $0x80] sm:$0xff] }
  0x39   : > { %2123 = vmatpush.bf16.msrb.mxu1 %v3758_v43  ;;  %1186 = vrot.lane.b32.xlu1 %v1147_v24, %s4141_s30  ;;  %v3703_v43 = vld [vmem:[%s4297_s28 + $0x28] sm:$0xff]  ;;  %v2536_v24 = vld [vmem:[%s4402_s12 + $0xd0] sm:$0xff] }
  0x3b   : > { %1936 = vmatpush.bf16.msrb.mxu0 %v3727_v45  ;;  %v3733_v45 = vld [vmem:[%s4297_s28 + $0x60] sm:$0xff] }
  0x3c   : > { %1779 = vmatpush.bf16.msrb.mxu3 %v3742_v44  ;;  %738 = vmatpush.bf16.msrb.mxu2 %v3712_v46  ;;  %v3718_v44 = vld [vmem:[%s4297_s28 + $0x58] sm:$0xff]  ;;  %v3748_v46 = vld [vmem:[%s4297_s28 + $0x68] sm:$0xff] }
  0x3d   : > { %2124 = vmatpush.bf16.msrb.mxu1 %v3757_v47  ;;  %v2530_v47 = vld [vmem:[%s4402_s12 + $0xa0] sm:$0xff] }
  0x3e   : > { %1190 = vrot.lane.b32.xlu0 %v1149_v22, %s4141_s30  ;;  %1188 = vrot.lane.b32.xlu2 %v1148_v30, %s4141_s30 }
  0x3f   : > { %1937 = vmatpush.bf16.msrb.mxu0 %v3726_v49  ;;  %v3704_v49 = vld [vmem:[%s4297_s28 + $0x30] sm:$0xff] }
  0x40   : > { %1780 = vmatpush.bf16.msrb.mxu3 %v3741_v48  ;;  %739 = vmatpush.bf16.msrb.mxu2 %v3711_v50  ;;  %v2531_v48 = vld [vmem:[%s4402_s12 + $0xa8] sm:$0xff]  ;;  %v3719_v50 = vld [vmem:[%s4297_s28 + $0x60] sm:$0xff] }
  0x41   : > { %2125 = vmatpush.bf16.msrb.mxu1 %v3756_v51  ;;  %1192 = vrot.lane.b32.xlu1 %v1150_v31, %s4141_s30  ;;  %v2538_v31 = vld [vmem:[%s4402_s12 + $0xe0] sm:$0xff] }
  0x42   : > { %3179 = vmatmul.msk.bf16.gmra.mxu0 %vm360_vm1, %v3686_v54  ;;  %3183 = vmatmul.msk.bf16.gmra.mxu2 %vm360_vm1, %v3690_v55  ;;  %v2529_v55 = vld [vmem:[%s4402_s12 + $0x98] sm:$0xff] }
  0x43   : > { %1938 = vmatpush.bf16.msrb.mxu0 %v3725_v53  ;;  %3247 = vmatmul.msk.bf16.gmra.mxu1 %vm360_vm1, %v3671_v56  ;;  %v3749_v53 = vld [vmem:[%s4297_s28 + $0x70] sm:$0xff] }
  0x44   : > { %1781 = vmatpush.bf16.msrb.mxu3 %v3740_v52  ;;  %740 = vmatpush.bf16.msrb.mxu2 %v3710_v58  ;;  %v3734_v52 = vld [vmem:[%s4297_s28 + $0x68] sm:$0xff] }
  0x45   : > { %3251 = vmatmul.msk.bf16.gmra.mxu3 %vm360_vm1, %v3675_v57  ;;  %2126 = vmatpush.bf16.msrb.mxu1 %v3755_v59 }
  0x46   : > { %1196 = vrot.lane.b32.xlu0 %v1152_v25, %s4141_s30  ;;  %1194 = vrot.lane.b32.xlu2 %v1151_v33, %s4141_s30  ;;  %v2535_v25 = vld [vmem:[%s4402_s12 + $0xc8] sm:$0xff] }
  0x47   : > { %1939 = vmatpush.bf16.msrb.mxu0 %v3724_v61  ;;  %v2533_v61 = vld [vmem:[%s4402_s12 + $0xb8] sm:$0xff]  ;;  %v2539_v33 = vld [vmem:[%s4402_s12 + $0xe8] sm:$0xff] }
  0x48   : > { %1782 = vmatpush.bf16.msrb.mxu3 %v3739_v60  ;;  %741 = vmatpush.bf16.msrb.mxu2 %v3709_v62 }
  0x49   : > { %2127 = vmatpush.bf16.msrb.mxu1 %v3754_v63  ;;  %1198 = vrot.lane.b32.xlu1 %v1153_v34, %s4141_s30 }
  0x4b   : > { %1940 = vmatpush.bf16.msrb.mxu0 %v3723_v1  ;;  %v3720_v1 = vld [vmem:[%s4297_s28 + $0x68] sm:$0xff] }
  0x4c   : > { %1783 = vmatpush.bf16.msrb.mxu3 %v3738_v0  ;;  %742 = vmatpush.bf16.msrb.mxu2 %v3708_v2  ;;  %v3705_v0 = vld [vmem:[%s4297_s28 + $0x38] sm:$0xff] }
  0x4d   : > { %2128 = vmatpush.bf16.msrb.mxu1 %v3753_v3 }
  0x4e   : > { %1202 = vrot.lane.b32.xlu0 %v1155_v32, %s4141_s30  ;;  %1200 = vrot.lane.b32.xlu2 %v1154_v40, %s4141_s30  ;;  %v2540_v32 = vld [vmem:[%s4402_s12 + $0xf0] sm:$0xff]  ;;  %v3737_v40 = vld [vmem:[%s4297_s28 + $0x80] sm:$0xff] }
  0x51   : > { %2562 = vrot.lane.b32.xlu1 %v2528_v41, %s4141_s30  ;;  %v3752_v41 = vld [vmem:[%s4297_s28 + $0x88] sm:$0xff] }
  0x52   : > { %3180 = vmatmul.msk.bf16.gmra.mxu0 %vm360_vm1, %v3687_v4  ;;  %3184 = vmatmul.msk.bf16.gmra.mxu2 %vm360_vm1, %v3691_v5  ;;  %v3735_v4 = vld [vmem:[%s4297_s28 + $0x70] sm:$0xff]  ;;  %v3750_v5 = vld [vmem:[%s4297_s28 + $0x78] sm:$0xff] }
  0x53   : > { %3248 = vmatmul.msk.bf16.gmra.mxu1 %vm360_vm1, %v3672_v6 }
  0x55   : > { %3252 = vmatmul.msk.bf16.gmra.mxu3 %vm360_vm1, %v3676_v7  ;;  %v2534_v7 = vld [vmem:[%s4402_s12 + $0xc0] sm:$0xff] }
  0x56   : > { %2560 = vrot.lane.b32.xlu0 %v2527_v35, %s4141_s30  ;;  %2558 = vrot.lane.b32.xlu2 %v2526_v42, %s4141_s30 }
  0x59   : > { %2568 = vrot.lane.b32.xlu1 %v2531_v48, %s4141_s30 }
  0x5e   : > { %2566 = vrot.lane.b32.xlu0 %v2530_v47, %s4141_s30  ;;  %2564 = vrot.lane.b32.xlu2 %v2529_v55, %s4141_s30 }
  0x61   : > { %2574 = vrot.lane.b32.xlu1 %v2534_v7, %s4141_s30 }
  0x62   : > { %3181 = vmatmul.msk.bf16.gmra.mxu0 %vm360_vm1, %v3688_v9  ;;  %3185 = vmatmul.msk.bf16.gmra.mxu2 %vm360_vm1, %v3692_v10 }
  0x63   : > { %3249 = vmatmul.msk.bf16.gmra.mxu1 %vm360_vm1, %v3673_v11 }
  0x65   : > { %3253 = vmatmul.msk.bf16.gmra.mxu3 %vm360_vm1, %v3677_v12 }
  0x66   : > { %2572 = vrot.lane.b32.xlu0 %v2533_v61, %s4141_s30  ;;  %2570 = vrot.lane.b32.xlu2 %v2532_v13, %s4141_s30 }
  0x69   : > { %2580 = vrot.lane.b32.xlu1 %v2537_v23, %s4141_s30 }
  0x6e   : > { %2578 = vrot.lane.b32.xlu0 %v2536_v24, %s4141_s30  ;;  %2576 = vrot.lane.b32.xlu2 %v2535_v25, %s4141_s30 }
  0x71   : > { %2586 = vrot.lane.b32.xlu1 %v2540_v32, %s4141_s30 }
  0x72   : > { %3344 = vmatmul.msk.bf16.vlgmr.msrb.gmra.mxu2 %vm360_vm1, %v3700_v16  ;;  %3542 = vmatmul.msk.bf16.vlgmr.msrb.gmra.mxu0 %vm360_vm1, %v3715_v17  ;;  %v3706_v16 = vld [vmem:[%s4297_s28 + $0x40] sm:$0xff]  ;;  %v3721_v17 = vld [vmem:[%s4297_s28 + $0x70] sm:$0xff] }
  0x73   : > { %3640 = vmatmul.msk.bf16.vlgmr.msrb.gmra.mxu1 %vm360_vm1, %v3745_v19 }
  0x75   : > { %3474 = vmatmul.msk.bf16.vlgmr.msrb.gmra.mxu3 %vm360_vm1, %v3730_v18 }
  0x76   : > { %2582 = vrot.lane.b32.xlu2 %v2538_v31, %s4141_s30  ;;  %2584 = vrot.lane.b32.xlu0 %v2539_v33, %s4141_s30 }
  0x82   : > { %3345 = vmatmul.msk.bf16.gmra.mxu2 %vm360_vm1, %v3701_v26  ;;  %3543 = vmatmul.msk.bf16.gmra.mxu0 %vm360_vm1, %v3716_v27 }
  0x83   : > { %3641 = vmatmul.msk.bf16.gmra.mxu1 %vm360_vm1, %v3746_v29 }
  0x85   : > { %3475 = vmatmul.msk.bf16.gmra.mxu3 %vm360_vm1, %v3731_v28 }
  0x92   : > { %3346 = vmatmul.msk.bf16.gmra.mxu2 %vm360_vm1, %v3702_v36  ;;  %3544 = vmatmul.msk.bf16.gmra.mxu0 %vm360_vm1, %v3717_v37  ;;  %v3707_v36 = vld [vmem:[%s4297_s28 + $0x48] sm:$0xff]  ;;  %v3722_v37 = vld [vmem:[%s4297_s28 + $0x78] sm:$0xff] }
  0x93   : > { %3642 = vmatmul.msk.bf16.gmra.mxu1 %vm360_vm1, %v3747_v39 }
  0x95   : > { %3476 = vmatmul.msk.bf16.gmra.mxu3 %vm360_vm1, %v3732_v38 }
  0xa2   : > { %3347 = vmatmul.msk.bf16.gmra.mxu2 %vm360_vm1, %v3703_v43  ;;  %3545 = vmatmul.msk.bf16.gmra.mxu0 %vm360_vm1, %v3718_v44  ;;  %v2541_v43 = vld [vmem:[%s4402_s12 + $0xf8] sm:$0xff]  ;;  %s4093_s12 = scalar_lea.hbm %s4092_s10, 256 }
  0xa3   : > { %3643 = vmatmul.msk.bf16.gmra.mxu1 %vm360_vm1, %v3748_v46  ;;  %2588 = vrot.lane.b32.xlu2 %v2541_v43, %s4141_s30  ;;  %p4094_p11 = scmp.ne.s32.totalorder %s4092_s10, %s4093_s12  ;;  %p4099_p1 = scmp.lt.s32.totalorder %s4097_s13, %s4093_s12 }
  0xa5   : > { %3477 = vmatmul.msk.bf16.gmra.mxu3 %vm360_vm1, %v3733_v45  ;;  %p4095_p12 = pnand %p4094_p11, %p4208_p5  ;;  %p4100_p2 = por %p4099_p1, %p4098_p0 }
  0xa7   : > { %p4096_p13 = pneg %p4095_p12 }
  0xa9   : > { %p4101_p3 = pnand %p4100_p2, %p4096_p13 }
  0xaf   : > { %v4492_v51 = vpop.f32.mrf.mxu0 }
  0xb0   : > { %v4496_v54 = vpop.f32.mrf.mxu1 }
  0xb2   : > { %3348 = vmatmul.msk.bf16.gmra.mxu2 %vm360_vm1, %v3704_v49  ;;  %3546 = vmatmul.msk.bf16.gmra.mxu0 %vm360_vm1, %v3719_v50 }
  0xb3   : > { %3644 = vmatmul.msk.bf16.gmra.mxu1 %vm360_vm1, %v3749_v53 }
  0xb5   : > { %3478 = vmatmul.msk.bf16.gmra.mxu3 %vm360_vm1, %v3734_v52  ;;  %v418_v56 = vpop.f32.mrf.mxu2 }
  0xb7   : > { %v4506_v59 = vpop.f32.mrf.mxu0 }
  0xb8   : > { %v575_v57 = vpop.f32.mrf.mxu3  ;;  %v4508_v60 = vpop.f32.mrf.mxu1 }
  0xb9   : > { %v4504_v58 = vadd.f32 %v575_v57, %v418_v56  ;;  %v556_v56 = vadd.f32 %v4496_v54, %v4492_v51  ;;  %v4597_v57 = vld [vmem:[%s6247_s2] ss:$0 sm:$0xff] }
  0xbd   : > { %v420_v62 = vpop.f32.mrf.mxu2 }
  0xbf   : > { %v4516_v3 = vpop.f32.mrf.mxu0 }
  0xc0   : > { %v577_v63 = vpop.f32.mrf.mxu3  ;;  %v4520_v6 = vpop.f32.mrf.mxu1 }
  0xc1   : > { %v4514_v2 = vadd.f32 %v577_v63, %v420_v62 }
  0xc2   : > { %3349 = vmatmul.msk.bf16.gmra.mxu2 %vm360_vm1, %v3705_v0  ;;  %3547 = vmatmul.msk.bf16.gmra.mxu0 %vm360_vm1, %v3720_v1  ;;  %v4602_v1 = vld [vmem:[%s6247_s2] ss:$0 sm:$0xff] }
  0xc3   : > { %3645 = vmatmul.msk.bf16.gmra.mxu1 %vm360_vm1, %v3750_v5 }
  0xc5   : > { %3479 = vmatmul.msk.bf16.gmra.mxu3 %vm360_vm1, %v3735_v4  ;;  %v423_v8 = vpop.f32.mrf.mxu2 }
  0xc7   : > { %v4530_v11 = vpop.f32.mrf.mxu0 }
  0xc8   : > { %v580_v9 = vpop.f32.mrf.mxu3  ;;  %v4532_v12 = vpop.f32.mrf.mxu1 }
  0xc9   : > { %v4528_v10 = vadd.f32 %v580_v9, %v423_v8  ;;  %v558_v8 = vadd.f32 %v4508_v60, %v4506_v59  ;;  %v561_v60 = vadd.f32 %v4520_v6, %v4516_v3 }
  0xcd   : > { %v425_v14 = vpop.f32.mrf.mxu2 }
  0xcf   : > { %v4540_v19 = vpop.f32.mrf.mxu0 }
  0xd0   : > { %v582_v15 = vpop.f32.mrf.mxu3  ;;  %v4544_v22 = vpop.f32.mrf.mxu1 }
  0xd1   : > { %v4538_v18 = vadd.f32 %v582_v15, %v425_v14 }
  0xd2   : > { %3350 = vmatmul.msk.bf16.gmra.mxu2 %vm360_vm1, %v3706_v16  ;;  %3548 = vmatmul.msk.bf16.gmra.mxu0 %vm360_vm1, %v3721_v17 }
  0xd3   : > { %3646 = vmatmul.msk.bf16.gmra.mxu1 %vm360_vm1, %v3751_v21 }
  0xd5   : > { %3480 = vmatmul.msk.bf16.gmra.mxu3 %vm360_vm1, %v3736_v20  ;;  %v428_v26 = vpop.f32.mrf.mxu2 }
  0xd7   : > { %v4558_v29 = vpop.f32.mrf.mxu0 }
  0xd8   : > { %v585_v27 = vpop.f32.mrf.mxu3  ;;  %v4560_v30 = vpop.f32.mrf.mxu1 }
  0xd9   : > { %v4556_v28 = vadd.f32 %v585_v27, %v428_v26 }
  0xdd   : > { %v430_v34 = vpop.f32.mrf.mxu2 }
  0xdf   : > { %v4572_v39 = vpop.f32.mrf.mxu0 }
  0xe0   : > { %v587_v35 = vpop.f32.mrf.mxu3  ;;  %v4576_v42 = vpop.f32.mrf.mxu1 }
  0xe1   : > { %v4570_v38 = vadd.f32 %v587_v35, %v430_v34 }
  0xe2   : > { %3351 = vmatmul.msk.bf16.gmra.mxu2 %vm360_vm1, %v3707_v36  ;;  %3549 = vmatmul.msk.bf16.gmra.mxu0 %vm360_vm1, %v3722_v37  ;;  %v563_v37 = vadd.f32 %v4532_v12, %v4530_v11 }
  0xe3   : > { %3647 = vmatmul.msk.bf16.gmra.mxu1 %vm360_vm1, %v3752_v41  ;;  %v4637_v41 = vpop.permute.xlu0 %1172 }
  0xe5   : > { %3481 = vmatmul.msk.bf16.gmra.mxu3 %vm360_vm1, %v3737_v40  ;;  %v433_v44 = vpop.f32.mrf.mxu2 }
  0xe7   : > { %v4586_v47 = vpop.f32.mrf.mxu0 }
  0xe8   : > { %v590_v45 = vpop.f32.mrf.mxu3  ;;  %v4588_v48 = vpop.f32.mrf.mxu1 }
  0xe9   : > { %v4584_v46 = vadd.f32 %v590_v45, %v433_v44 }
  0xed   : > { %v435_v49 = vpop.f32.mrf.mxu2 }
  0xef   : > { %v1942_v53 = vpop.f32.mrf.mxu0 }
  0xf0   : > { %v592_v50 = vpop.f32.mrf.mxu3  ;;  %v2130_v55 = vpop.f32.mrf.mxu1 }
  0xf1   : > { %v4590_v52 = vadd.f32 %v592_v50, %v435_v49 }
  0xf5   : > { %v744_v61 = vpop.f32.mrf.mxu2 }
  0xf6   : > { %v784_v62 = vadd.f32 %v744_v61, %v556_v56  ;;  %v566_v61 = vadd.f32 %v4544_v22, %v4540_v19  ;;  %v4660_v19 = vpop.permute.xlu1 %1176 }
  0xf7   : > { %v1944_v4 = vpop.f32.mrf.mxu0  ;;  %6268 = vst [vmem:[#allocation7_spill] sm:$0xff] %v4660_v19 }
  0xf8   : > { %v1785_v63 = vpop.f32.mrf.mxu3  ;;  %v4605_v5 = vadd.f32 %v4597_v57, %v784_v62  ;;  %v2132_v7 = vpop.f32.mrf.mxu1 }
  0xf9   : > { %v1943_v0 = vadd.f32 %v1942_v53, %v1785_v63 }
  0xfa   : > { %3821 = vtanh.f32 %v4605_v5 }
  0xfb   : > { %v2170_v51 = vadd.f32 %v2130_v55, %v1943_v0 }
  0xfd   : > { %v4609_v54 = vadd.f32 %v4602_v1, %v2170_v51  ;;  %v746_v9 = vpop.f32.mrf.mxu2 }
  0xfe   : > { %v785_v13 = vadd.f32 %v746_v9, %v558_v8  ;;  %v4654_v9 = vpop.permute.xlu0 %1174 }
  0xff   : > { %3823 = vtanh.f32 %v4609_v54  ;;  %v1947_v16 = vpop.f32.mrf.mxu0  ;;  %6267 = vst [vmem:[#allocation6_spill] sm:$0xff] %v4654_v9 }
 0x100   : > { %v1787_v14 = vpop.f32.mrf.mxu3  ;;  %v3822_v17 = vpop.eup %3821  ;;  %v4615_v20 = vadd.f32 %v4597_v57, %v785_v13 }
 0x101   : > { %v1945_v15 = vadd.f32 %v1944_v4, %v1787_v14  ;;  %v2135_v21 = vpop.f32.mrf.mxu1  ;;  %1252 = vrot.lane.b32.xlu1 %v3822_v17, %s4141_s30  ;;  %v4652_v4 = vpop.permute.xlu2 %1180  ;;  %v568_v17 = vadd.f32 %v4560_v30, %v4558_v29 }
 0x102   : > { %3825 = vtanh.f32 %v4615_v20  ;;  %6266 = vst [vmem:[#allocation5_spill] sm:$0xff] %v4652_v4 }
 0x103   : > { %v2171_v23 = vadd.f32 %v2132_v7, %v1945_v15 }
 0x105   : > { %v3824_v24 = vpop.eup %3823  ;;  %v4620_v59 = vadd.f32 %v4602_v1, %v2171_v23  ;;  %v749_v25 = vpop.f32.mrf.mxu2 }
 0x106   : > { %2638 = vrot.lane.b32.xlu0 %v3824_v24, %s4141_s30  ;;  %v786_v26 = vadd.f32 %v749_v25, %v561_v60  ;;  %v4676_v29 = vpop.permute.xlu0 %1184 }
 0x107   : > { %3827 = vtanh.f32 %v4620_v59  ;;  %v1949_v32 = vpop.f32.mrf.mxu0  ;;  %6270 = vst [vmem:[#allocation9_spill] sm:$0xff] %v4676_v29 }
 0x108   : > { %v1790_v27 = vpop.f32.mrf.mxu3  ;;  %v3826_v33 = vpop.eup %3825  ;;  %v4627_v34 = vadd.f32 %v4597_v57, %v786_v26 }
 0x109   : > { %v1948_v31 = vadd.f32 %v1947_v16, %v1790_v27  ;;  %v2137_v35 = vpop.f32.mrf.mxu1  ;;  %1254 = vrot.lane.b32.xlu2 %v3826_v33, %s4141_s30 }
 0x10a   : > { %3829 = vtanh.f32 %v4627_v34 }
 0x10b   : > { %v2172_v36 = vadd.f32 %v2135_v21, %v1948_v31 }
 0x10d   : > { %v4632_v3 = vadd.f32 %v4602_v1, %v2172_v36  ;;  %v3828_v6 = vpop.eup %3827  ;;  %v751_v40 = vpop.f32.mrf.mxu2  ;;  %v571_v36 = vadd.f32 %v4576_v42, %v4572_v39 }
 0x10e   : > { %2640 = vrot.lane.b32.xlu1 %v3828_v6, %s4141_s30  ;;  %v787_v43 = vadd.f32 %v751_v40, %v563_v37  ;;  %v4684_v6 = vpop.permute.xlu1 %1178 }
 0x10f   : > { %3831 = vtanh.f32 %v4632_v3  ;;  %v1952_v49 = vpop.f32.mrf.mxu0 }
 0x110   : > { %v1792_v44 = vpop.f32.mrf.mxu3  ;;  %v3830_v50 = vpop.eup %3829  ;;  %v4641_v53 = vadd.f32 %v4597_v57, %v787_v43 }
 0x111   : > { %v1950_v45 = vadd.f32 %v1949_v32, %v1792_v44  ;;  %v2140_v55 = vpop.f32.mrf.mxu1  ;;  %1256 = vrot.lane.b32.xlu0 %v3830_v50, %s4141_s30  ;;  %v4673_v32 = vpop.permute.xlu2 %1182 }
 0x112   : > { %3833 = vtanh.f32 %v4641_v53  ;;  %6269 = vst [vmem:[#allocation8_spill] sm:$0xff] %v4673_v32 }
 0x113   : > { %v2173_v56 = vadd.f32 %v2137_v35, %v1950_v45 }
 0x115   : > { %v4646_v11 = vadd.f32 %v4602_v1, %v2173_v56  ;;  %v3832_v12 = vpop.eup %3831  ;;  %v754_v62 = vpop.f32.mrf.mxu2 }
 0x116   : > { %2642 = vrot.lane.b32.xlu2 %v3832_v12, %s4141_s30  ;;  %v788_v63 = vadd.f32 %v754_v62, %v566_v61  ;;  %v573_v61 = vadd.f32 %v4588_v48, %v4586_v47  ;;  %v4700_v62 = vpop.permute.xlu0 %1190 }
 0x117   : > { %3835 = vtanh.f32 %v4646_v11  ;;  %v1954_v51 = vpop.f32.mrf.mxu0  ;;  %6272 = vst [vmem:[#allocation11_spill] sm:$0xff] %v4700_v62 }
 0x118   : > { %v1795_v0 = vpop.f32.mrf.mxu3  ;;  %v3834_v8 = vpop.eup %3833  ;;  %v4657_v13 = vadd.f32 %v4597_v57, %v788_v63 }
 0x119   : > { %v1953_v7 = vadd.f32 %v1952_v49, %v1795_v0  ;;  %v2142_v14 = vpop.f32.mrf.mxu1  ;;  %1258 = vrot.lane.b32.xlu1 %v3834_v8, %s4141_s30  ;;  %v4693_v39 = vpop.permute.xlu2 %1188 }
 0x11a   : > { %3837 = vtanh.f32 %v4657_v13  ;;  %6271 = vst [vmem:[#allocation10_spill] sm:$0xff] %v4693_v39  ;;  %v4703_v0 = vpop.permute.xlu1 %1186 }
 0x11b   : > { %v2174_v15 = vadd.f32 %v2140_v55, %v1953_v7  ;;  %6273 = vst [vmem:[#allocation12_spill] sm:$0xff] %v4703_v0 }
 0x11d   : > { %v4664_v22 = vadd.f32 %v4602_v1, %v2174_v15  ;;  %v3836_v16 = vpop.eup %3835  ;;  %v756_v21 = vpop.f32.mrf.mxu2 }
 0x11e   : > { %2644 = vrot.lane.b32.xlu0 %v3836_v16, %s4141_s30  ;;  %v789_v23 = vadd.f32 %v756_v21, %v568_v17 }
 0x11f   : > { %3839 = vtanh.f32 %v4664_v22  ;;  %v1957_v25 = vpop.f32.mrf.mxu0 }
 0x120   : > { %v1797_v24 = vpop.f32.mrf.mxu3  ;;  %v3838_v26 = vpop.eup %3837  ;;  %v4671_v27 = vadd.f32 %v4597_v57, %v789_v23 }
 0x121   : > { %v1955_v60 = vadd.f32 %v1954_v51, %v1797_v24  ;;  %v2145_v31 = vpop.f32.mrf.mxu1  ;;  %1260 = vrot.lane.b32.xlu2 %v3838_v26, %s4141_s30  ;;  %v4714_v23 = vpop.permute.xlu2 %1194 }
 0x122   : > { %3841 = vtanh.f32 %v4671_v27  ;;  %6274 = vst [vmem:[#allocation13_spill] sm:$0xff] %v4714_v23 }
 0x123   : > { %v2175_v33 = vadd.f32 %v2142_v14, %v1955_v60  ;;  %v4717_v60 = vpop.permute.xlu0 %1196 }
 0x124   : > { %6275 = vst [vmem:[#allocation14_spill] sm:$0xff] %v4717_v60 }
 0x125   : > { %v4680_v30 = vadd.f32 %v4602_v1, %v2175_v33  ;;  %v3840_v35 = vpop.eup %3839  ;;  %v759_v37 = vpop.f32.mrf.mxu2 }
 0x126   : > { %2646 = vrot.lane.b32.xlu1 %v3840_v35, %s4141_s30  ;;  %v790_v40 = vadd.f32 %v759_v37, %v571_v36  ;;  %v4721_v36 = vpop.permute.xlu1 %1192 }
 0x127   : > { %3843 = vtanh.f32 %v4680_v30  ;;  %v1959_v45 = vpop.f32.mrf.mxu0  ;;  %6276 = vst [vmem:[#allocation15_spill] sm:$0xff] %v4721_v36 }
 0x128   : > { %v1800_v43 = vpop.f32.mrf.mxu3  ;;  %v3842_v49 = vpop.eup %3841  ;;  %v4689_v50 = vadd.f32 %v4597_v57, %v790_v40 }
 0x129   : > { %v1958_v44 = vadd.f32 %v1957_v25, %v1800_v43  ;;  %v2147_v55 = vpop.f32.mrf.mxu1  ;;  %1262 = vrot.lane.b32.xlu0 %v3842_v49, %s4141_s30 }
 0x12a   : > { %3845 = vtanh.f32 %v4689_v50 }
 0x12b   : > { %v2176_v56 = vadd.f32 %v2145_v31, %v1958_v44 }
 0x12d   : > { %v4696_v42 = vadd.f32 %v4602_v1, %v2176_v56  ;;  %v3844_v12 = vpop.eup %3843  ;;  %v761_v63 = vpop.f32.mrf.mxu2  ;;  %v3648_v56 = vmul.f32 -1.442695, %v4609_v54 }
 0x12e   : > { %2648 = vrot.lane.b32.xlu2 %v3844_v12, %s4141_s30  ;;  %v791_v7 = vadd.f32 %v761_v63, %v573_v61  ;;  %v4735_v12 = vpop.permute.xlu2 %1200 }
 0x12f   : > { %3847 = vtanh.f32 %v4696_v42  ;;  %v1962_v14 = vpop.f32.mrf.mxu0  ;;  %6277 = vst [vmem:[#allocation16_spill] sm:$0xff] %v4735_v12 }
 0x130   : > { %v1802_v51 = vpop.f32.mrf.mxu3  ;;  %v3846_v15 = vpop.eup %3845  ;;  %v4707_v16 = vadd.f32 %v4597_v57, %v791_v7 }
 0x131   : > { %v1960_v8 = vadd.f32 %v1959_v45, %v1802_v51  ;;  %v2150_v17 = vpop.f32.mrf.mxu1  ;;  %1264 = vrot.lane.b32.xlu1 %v3846_v15, %s4141_s30  ;;  %v4737_v51 = vpop.permute.xlu0 %1202 }
 0x132   : > { %3849 = vtanh.f32 %v4707_v16  ;;  %6278 = vst [vmem:[#allocation17_spill] sm:$0xff] %v4737_v51 }
 0x133   : > { %v2177_v21 = vadd.f32 %v2147_v55, %v1960_v8 }
 0x135   : > { %v4712_v47 = vadd.f32 %v4602_v1, %v2177_v21  ;;  %v3848_v48 = vpop.eup %3847  ;;  %v764_v24 = vpop.f32.mrf.mxu2  ;;  %v3649_v21 = vmul.f32 -1.442695, %v4620_v59 }
 0x136   : > { %2650 = vrot.lane.b32.xlu0 %v3848_v48, %s4141_s30  ;;  %v792_v25 = vadd.f32 %v764_v24, %v4504_v58  ;;  %v3352_v48 = vmul.f32 -1.442695, %v4605_v5  ;;  %v4758_v5 = vpop.permute.xlu2 %2558 }
 0x137   : > { %3851 = vtanh.f32 %v4712_v47  ;;  %v1964_v33 = vpop.f32.mrf.mxu0 }
 0x138   : > { %v1805_v26 = vpop.f32.mrf.mxu3  ;;  %v3850_v35 = vpop.eup %3849  ;;  %v4724_v37 = vadd.f32 %v4597_v57, %v792_v25 }
 0x139   : > { %v1963_v31 = vadd.f32 %v1962_v14, %v1805_v26  ;;  %v2152_v40 = vpop.f32.mrf.mxu1  ;;  %1266 = vrot.lane.b32.xlu2 %v3850_v35, %s4141_s30 }
 0x13a   : > { %3853 = vtanh.f32 %v4724_v37 }
 0x13b   : > { %v2178_v43 = vadd.f32 %v2150_v17, %v1963_v31  ;;  %v4743_v17 = vpop.permute.xlu1 %1198  ;;  %v3353_v31 = vmul.f32 -1.442695, %v4615_v20 }
 0x13c   : > { %6279 = vst [vmem:[#allocation18_spill] sm:$0xff] %v4743_v17 }
 0x13d   : > { %v4729_v44 = vadd.f32 %v4602_v1, %v2178_v43  ;;  %v3852_v45 = vpop.eup %3851  ;;  %v766_v58 = vpop.f32.mrf.mxu2 }
 0x13e   : > { %2652 = vrot.lane.b32.xlu1 %v3852_v45, %s4141_s30  ;;  %v793_v49 = vadd.f32 %v766_v58, %v4514_v2 }
 0x13f   : > { %3855 = vtanh.f32 %v4729_v44  ;;  %v1967_v63 = vpop.f32.mrf.mxu0 }
 0x140   : > { %v1807_v55 = vpop.f32.mrf.mxu3  ;;  %v3854_v7 = vpop.eup %3853  ;;  %v4740_v8 = vadd.f32 %v4597_v57, %v793_v49 }
 0x141   : > { %v1965_v61 = vadd.f32 %v1964_v33, %v1807_v55  ;;  %v2155_v14 = vpop.f32.mrf.mxu1  ;;  %1268 = vrot.lane.b32.xlu0 %v3854_v7, %s4141_s30  ;;  %v4761_v49 = vpop.permute.xlu0 %2560 }
 0x142   : > { %3857 = vtanh.f32 %v4740_v8 }
 0x143   : > { %v2179_v15 = vadd.f32 %v2152_v40, %v1965_v61  ;;  %3859 = vpow2.f32 %v3648_v56  ;;  %v4769_v56 = vpop.permute.xlu1 %2562  ;;  %v3650_v61 = vmul.f32 -1.442695, %v4632_v3  ;;  %v4779_v3 = vpop.permute.xlu2 %2564 }
 0x144   : > { %6280 = vst [vmem:[#allocation19_spill] sm:$0xff] %v4769_v56 }
 0x145   : > { %v4747_v2 = vadd.f32 %v4602_v1, %v2179_v15  ;;  %v3856_v54 = vpop.eup %3855  ;;  %v769_v24 = vpop.f32.mrf.mxu2  ;;  %6281 = vst [vmem:[#allocation20_spill] sm:$0xff] %v4779_v3 }
 0x146   : > { %2654 = vrot.lane.b32.xlu2 %v3856_v54, %s4141_s30  ;;  %v794_v25 = vadd.f32 %v769_v24, %v4528_v10 }
 0x147   : > { %3861 = vtanh.f32 %v4747_v2  ;;  %v1969_v35 = vpop.f32.mrf.mxu0 }
 0x148   : > { %v1810_v26 = vpop.f32.mrf.mxu3  ;;  %v3858_v40 = vpop.eup %3857  ;;  %3863 = vpow2.f32 %v3649_v21  ;;  %v4756_v43 = vadd.f32 %v4597_v57, %v794_v25 }
 0x149   : > { %v1968_v33 = vadd.f32 %v1967_v63, %v1810_v26  ;;  %v3860_v59 = vpop.eup %3859  ;;  %3865 = vpow2.f32 %v3352_v48  ;;  %1270 = vrot.lane.b32.xlu1 %v3858_v40, %s4141_s30  ;;  %v2157_v58 = vpop.f32.mrf.mxu1 }
 0x14a   : > { %3867 = vtanh.f32 %v4756_v43  ;;  %v4767_v55 = vadd.f32 1.0, %v3860_v59 }
 0x14b   : > { %v2180_v45 = vadd.f32 %v2155_v14, %v1968_v33  ;;  %3869 = vpow2.f32 %v3353_v31  ;;  %v3651_v14 = vmul.f32 -1.442695, %v4646_v11 }
 0x14c   : > { %vm2275_vm2 = vweird.f32 %v4767_v55 }
 0x14d   : > { %v4765_v10 = vadd.f32 %v4602_v1, %v2180_v45  ;;  %v3862_v20 = vpop.eup %3861  ;;  %v771_v63 = vpop.f32.mrf.mxu2 }
 0x14e   : > { %2656 = vrot.lane.b32.xlu0 %v3862_v20, %s4141_s30  ;;  %v3864_v7 = vpop.eup %3863  ;;  %v795_v15 = vadd.f32 %v771_v63, %v4538_v18  ;;  %v4785_v18 = vpop.permute.xlu0 %2566 }
 0x14f   : > { %3871 = vtanh.f32 %v4765_v10  ;;  %v3866_v21 = vpop.eup %3865  ;;  %v1972_v25 = vpop.f32.mrf.mxu0  ;;  %v4777_v31 = vadd.f32 1.0, %v3864_v7  ;;  %6282 = vst [vmem:[#allocation21_spill] sm:$0xff] %v4785_v18 }
 0x150   : > { %v1812_v54 = vpop.f32.mrf.mxu3  ;;  %v3868_v24 = vpop.eup %3867  ;;  %3873 = vrcp.f32 %v4767_v55  ;;  %v4782_v33 = vadd.f32 %v4597_v57, %v795_v15 }
 0x151   : > { %v1970_v48 = vadd.f32 %v1969_v35, %v1812_v54  ;;  %v3870_v26 = vpop.eup %3869  ;;  %3875 = vpow2.f32 %v3650_v61  ;;  %1272 = vrot.lane.b32.xlu2 %v3868_v24, %s4141_s30  ;;  %v4787_v35 = vadd.f32 1.0, %v3866_v21  ;;  %v2160_v40 = vpop.f32.mrf.mxu1  ;;  %v3354_v54 = vmul.f32 -1.442695, %v4627_v34 }
 0x152   : > { %3877 = vpow2.f32 %v3651_v14  ;;  %v4790_v45 = vadd.f32 1.0, %v3870_v26  ;;  %v4792_v20 = vpop.permute.xlu1 %2568  ;;  %v3355_v24 = vmul.f32 -1.442695, %v4641_v53  ;;  %v2296_v62 = vand.u32 2147483648, %v4777_v31 }
 0x153   : > { %v2181_v11 = vadd.f32 %v2157_v58, %v1970_v48  ;;  %3879 = vtanh.f32 %v4782_v33  ;;  %6283 = vst [vmem:[#allocation22_spill] sm:$0xff] %v4792_v20  ;;  %vm2290_vm5 = vweird.f32 %v4777_v31  ;;  %vm889_vm12 = vweird.f32 %v4787_v35 }
 0x154   : > { %3881 = vrcp.f32 %v4777_v31  ;;  %vm904_vm10 = vweird.f32 %v4790_v45 }
 0x155   : > { %v3872_v59 = vpop.eup %3871  ;;  %v4796_v61 = vadd.f32 %v4602_v1, %v2181_v11  ;;  %v774_v58 = vpop.f32.mrf.mxu2  ;;  %3883 = vrcp.f32 %v4787_v35 }
 0x156   : > { %2658 = vrot.lane.b32.xlu1 %v3872_v59, %s4141_s30  ;;  %v4799_v63 = vpop.eup %3873  ;;  %v796_v7 = vadd.f32 %v774_v58, %v4556_v28  ;;  %3885 = vrcp.f32 %v4790_v45  ;;  %v4811_v28 = vpop.permute.xlu2 %2570 }
 0x157   : > { %v3876_v15 = vpop.eup %3875  ;;  %v2271_v59 = vmul.f32 %v4799_v63, %v4767_v55  ;;  %6284 = vst [vmem:[#allocation23_spill] sm:$0xff] %v4811_v28  ;;  %3887 = vtanh.f32 %v4796_v61  ;;  %v4816_v34 = vpop.permute.xlu0 %2572  ;;  %vm2276_vm3 = vweird.f32 %v4799_v63 }
 0x158   : > { %v1815_v14 = vpop.f32.mrf.mxu3  ;;  %v3878_v48 = vpop.eup %3877  ;;  %v4807_v26 = vadd.f32 %v4597_v57, %v796_v7  ;;  %v4814_v12 = vadd.f32 1.0, %v3876_v15  ;;  %6285 = vst [vmem:[#allocation24_spill] sm:$0xff] %v4816_v34  ;;  %v3652_v7 = vmul.f32 -1.442695, %v4664_v22  ;;  %v895_v22 = vand.u32 2147483648, %v4787_v35  ;;  %vm4904_vm7 = vmor %vm2275_vm2, %vm2276_vm3 }
 0x159   : > { %v1973_v21 = vadd.f32 %v1972_v25, %v1815_v14  ;;  %v3880_v11 = vpop.eup %3879  ;;  %v1974_v53 = vpop.f32.mrf.mxu0  ;;  %v4826_v51 = vadd.f32 1.0, %v3878_v48  ;;  %v2272_v23 = vsub.f32 1.0, %v2271_v59  ;;  %v2281_v48 = vand.u32 2147483648, %v4767_v55 }
 0x15a   : > { %3889 = vtanh.f32 %v4807_v26  ;;  %1274 = vrot.lane.b32.xlu0 %v3880_v11, %s4141_s30  ;;  %v4820_v25 = vpop.eup %3881  ;;  %v3356_v11 = vmul.f32 -1.442695, %v4657_v13  ;;  %v2279_v59 = vand.u32 2147483647, %v4767_v55  ;;  %v4860_v32 = vor.u32 1.1754944e-38, %v895_v22 }
 0x15b   : > { %v2182_v58 = vadd.f32 %v2160_v40, %v1973_v21  ;;  %3891 = vpow2.f32 %v3354_v54  ;;  %v4828_v40 = vpop.permute.xlu1 %2574  ;;  %v4831_v21 = vpop.eup %3883  ;;  %vm2291_vm11 = vweird.f32 %v4820_v25  ;;  %vm2305_vm14 = vweird.f32 %v4814_v12 }
 0x15c   : > { %3893 = vpow2.f32 %v3355_v24  ;;  %6286 = vst [vmem:[#allocation25_spill] sm:$0xff] %v4828_v40  ;;  %v2162_v54 = vpop.f32.mrf.mxu1  ;;  %v2286_v24 = vmul.f32 %v4820_v25, %v4777_v31  ;;  %v3653_v40 = vmul.f32 -1.442695, %v4680_v30  ;;  %vm4877_vm4 = vcmp.eq.f32.partialorder %v2279_v59, 8.507059e+37  ;;  %vm4956_vm13 = vmor %vm2290_vm5, %vm2291_vm11 }
 0x15d   : > { %v4824_v14 = vadd.f32 %v4602_v1, %v2182_v58  ;;  %v776_v17 = vpop.f32.mrf.mxu2  ;;  %v4836_v58 = vpop.eup %3885  ;;  %vm890_vm9 = vweird.f32 %v4831_v21  ;;  %v2309_v22 = vand.u32 2147483647, %v4814_v12 }
 0x15e   : > { %v797_v15 = vadd.f32 %v776_v17, %v4570_v38  ;;  %v3888_v13 = vpop.eup %3887  ;;  %v910_v38 = vand.u32 2147483648, %v4790_v45  ;;  %v2287_v30 = vsub.f32 1.0, %v2286_v24  ;;  %vm905_vm6 = vweird.f32 %v4836_v58  ;;  %vm5032_vm5 = vmor %vm889_vm12, %vm890_vm9 }
 0x15f   : > { %3895 = vtanh.f32 %v4824_v14  ;;  %2660 = vrot.lane.b32.xlu2 %v3888_v13, %s4141_s30  ;;  %v4858_v13 = vpop.permute.xlu0 %2578  ;;  %vm4998_vm0 = vcmp.eq.f32.partialorder %v2309_v22, 8.507059e+37  ;;  %vm5008_vm1 = vmor %vm904_vm10, %vm905_vm6 }
 0x160   : > { %3897 = vrcp.f32 %v4814_v12  ;;  %v1817_v60 = vpop.f32.mrf.mxu3  ;;  %v3890_v36 = vpop.eup %3889  ;;  %v4849_v28 = vadd.f32 %v4597_v57, %v797_v15  ;;  %6287 = vst [vmem:[#allocation26_spill] sm:$0xff] %v4858_v13  ;;  %v4889_v34 = vor.u32 1.1754944e-38, %v910_v38  ;;  %v2288_v29 = vmul.f32 %v4820_v25, %v2287_v30 }
 0x161   : > { %3899 = vpow2.f32 %v3652_v7  ;;  %v1975_v39 = vadd.f32 %v1974_v53, %v1817_v60  ;;  %v3892_v17 = vpop.eup %3891  ;;  %v2273_v7 = vmul.f32 %v4799_v63, %v2272_v23  ;;  %1276 = vrot.lane.b32.xlu1 %v3890_v36, %s4141_s30  ;;  %v4855_v53 = vor.u32 1.1754944e-38, %v2281_v48  ;;  %v1977_v15 = vpop.f32.mrf.mxu0 }
 0x162   : > { %3901 = vrcp.f32 %v4826_v51  ;;  %v3894_v60 = vpop.eup %3893  ;;  %v4874_v24 = vadd.f32 1.0, %v3892_v17  ;;  %v4887_v17 = vor.u32 1.1754944e-38, %v2296_v62 }
 0x163   : > { %3903 = vpow2.f32 %v3356_v11  ;;  %v2183_v0 = vadd.f32 %v2162_v54, %v1975_v39  ;;  %v4862_v11 = vpop.permute.xlu2 %2576  ;;  %v900_v39 = vmul.f32 %v4836_v58, %v4790_v45  ;;  %v885_v54 = vmul.f32 %v4831_v21, %v4787_v35 }
 0x164   : > { %3905 = vtanh.f32 %v4849_v28  ;;  %6288 = vst [vmem:[#allocation27_spill] sm:$0xff] %v4862_v11  ;;  %v4882_v11 = vpop.permute.xlu1 %2580  ;;  %v2274_v13 = vadd.f32 %v4799_v63, %v2273_v7  ;;  %v2165_v4 = vpop.f32.mrf.mxu1 }
 0x165   : > { %v3896_v20 = vpop.eup %3895  ;;  %v4865_v23 = vadd.f32 %v4602_v1, %v2183_v0  ;;  %3907 = vpow2.f32 %v3653_v40  ;;  %v2294_v0 = vand.u32 2147483647, %v4777_v31  ;;  %6291 = vst [vmem:[#allocation28_spill] sm:$0xff] %v4882_v11  ;;  %v779_v59 = vpop.f32.mrf.mxu2  ;;  %v4893_v40 = vadd.f32 1.0, %v3894_v60 }
 0x166   : > { %v4872_v48 = vpop.eup %3897  ;;  %2662 = vrot.lane.b32.xlu0 %v3896_v20, %s4141_s30  ;;  %v798_v20 = vadd.f32 %v779_v59, %v4584_v46  ;;  %v901_v56 = vsub.f32 1.0, %v900_v39  ;;  %v886_v38 = vsub.f32 1.0, %v885_v54  ;;  %v3357_v46 = vmul.f32 -1.442695, %v4671_v27 }
 0x167   : > { %v3900_v36 = vpop.eup %3899  ;;  %3909 = vtanh.f32 %v4865_v23  ;;  %vm4909_vm8 = vcmp.eq.f32.partialorder %v2294_v0, 8.507059e+37  ;;  %v2278_v55 = vsel %vm4904_vm7, %v4799_v63, %v2274_v13  ;;  %v2289_v59 = vadd.f32 %v4820_v25, %v2288_v29 }
 0x168   : > { %v4891_v3 = vpop.eup %3901  ;;  %v1820_v11 = vpop.f32.mrf.mxu3  ;;  %3911 = vrcp.f32 %v4874_v24  ;;  %v4919_v39 = vadd.f32 1.0, %v3900_v36  ;;  %v2311_v36 = vand.u32 2147483648, %v4814_v12  ;;  %v902_v13 = vmul.f32 %v4836_v58, %v901_v56 }
 0x169   : > { %v3904_v7 = vpop.eup %3903  ;;  %v1978_v62 = vadd.f32 %v1977_v15, %v1820_v11  ;;  %v2301_v15 = vmul.f32 %v4872_v48, %v4814_v12  ;;  %v4916_v11 = vadd.f32 %v4597_v57, %v798_v20  ;;  %v2316_v27 = vmul.f32 %v4891_v3, %v4826_v51  ;;  %v1979_v60 = vpop.f32.mrf.mxu0 }
 0x16a   : > { %v3906_v19 = vpop.eup %3905  ;;  %3913 = vrcp.f32 %v4893_v40  ;;  %v4933_v63 = vadd.f32 1.0, %v3904_v7  ;;  %v3654_v20 = vmul.f32 -1.442695, %v4696_v42  ;;  %v887_v9 = vmul.f32 %v4831_v21, %v886_v38 }
 0x16b   : > { %v2184_v54 = vadd.f32 %v2165_v4, %v1978_v62  ;;  %1278 = vrot.lane.b32.xlu2 %v3906_v19, %s4141_s30  ;;  %v3908_v0 = vpop.eup %3907  ;;  %3915 = vtanh.f32 %v4916_v11  ;;  %v2302_v29 = vsub.f32 1.0, %v2301_v15  ;;  %v4941_v62 = vpop.permute.xlu0 %2584  ;;  %v4948_v56 = vsel %vm4877_vm4, %v4855_v53, %v2278_v55 }
 0x16c   : > { %3917 = vpow2.f32 %v3357_v46  ;;  %6296 = vst [vmem:[#allocation29_spill] sm:$0xff] %v4941_v62  ;;  %v4950_v7 = vadd.f32 1.0, %v3908_v0  ;;  %v2317_v46 = vsub.f32 1.0, %v2316_v27  ;;  %v4960_v15 = vpop.permute.xlu2 %2582  ;;  %v2293_v53 = vsel %vm4956_vm13, %v4820_v25, %v2289_v59  ;;  %v4971_v31 = vpop.permute.xlu1 %2586 }
 0x16d   : > { %v4938_v4 = vadd.f32 %v4602_v1, %v2184_v54  ;;  %v3910_v19 = vpop.eup %3909  ;;  %3919 = vrcp.f32 %v4919_v39  ;;  %6299 = vst [vmem:[#allocation30_spill] sm:$0xff] %v4960_v15  ;;  %v6301_v27 = vand.u32 2147483647, %v4787_v35  ;;  %v4980_v0 = vor.u32 1.1754944e-38, %v2311_v36  ;;  %v781_v59 = vpop.f32.mrf.mxu2 }
 0x16e   : > { %2664 = vrot.lane.b32.xlu1 %v3910_v19, %s4141_s30  ;;  %v4963_v38 = vpop.eup %3911  ;;  %6300 = vst [vmem:[#allocation31_spill] sm:$0xff] %v4971_v31  ;;  %v4983_v25 = vadd.f32 %v4836_v58, %v902_v13  ;;  %v2167_v42 = vpop.f32.mrf.mxu1  ;;  %v2303_v31 = vmul.f32 %v4872_v48, %v2302_v29  ;;  %v888_v62 = vadd.f32 %v4831_v21, %v887_v9  ;;  %v3358_v13 = vmul.f32 -1.442695, %v4689_v50 }
 0x16f   : > { %3921 = vtanh.f32 %v4938_v4  ;;  %vm4975_vm15 = vcmp.eq.f32.partialorder %v6301_v27, 8.507059e+37  ;;  %v2324_v27 = vand.u32 2147483647, %v4826_v51  ;;  %v4994_v36 = vsel %vm4909_vm8, %v4887_v17, %v2293_v53 }
 0x170   : > { %v1822_v55 = vpop.f32.mrf.mxu3  ;;  %3923 = vrcp.f32 %v4933_v63  ;;  %v4985_v15 = vpop.eup %3913  ;;  %v3359_v29 = vmul.f32 -1.442695, %v4707_v16  ;;  %v2326_v9 = vand.u32 2147483648, %v4826_v51  ;;  %v6308_v50 = vand.u32 2147483647, %v4790_v45 }
 0x171   : > { %v1980_v19 = vadd.f32 %v1979_v60, %v1822_v55  ;;  %3925 = vpow2.f32 %v3654_v20  ;;  %v3916_v18 = vpop.eup %3915  ;;  %v2318_v60 = vmul.f32 %v4891_v3, %v2317_v46  ;;  %v799_v46 = vadd.f32 %v781_v59, %v4590_v52 }
 0x172   : > { %3927 = vrcp.f32 %v4950_v7  ;;  %v3918_v55 = vpop.eup %3917  ;;  %vm5014_vm2 = vcmp.eq.f32.partialorder %v6308_v50, 8.507059e+37  ;;  %1280 = vrot.lane.b32.xlu0 %v3916_v18, %s4141_s30  ;;  %vm2306_vm3 = vweird.f32 %v4872_v48  ;;  %vm2320_vm4 = vweird.f32 %v4826_v51 }
 0x173   : > { %v2185_v53 = vadd.f32 %v2167_v42, %v1980_v19  ;;  %v5020_v16 = vpop.eup %3919  ;;  %v907_v45 = vsel %vm5008_vm1, %v4836_v58, %v4983_v25  ;;  %v915_v18 = vmul.f32 %v4963_v38, %v4874_v24  ;;  %v2304_v59 = vadd.f32 %v4872_v48, %v2303_v31  ;;  %vm5066_vm8 = vmor %vm2305_vm14, %vm2306_vm3 }
 0x174   : > { %vm5039_vm6 = vcmp.eq.f32.partialorder %v2324_v27, 8.507059e+37  ;;  %v892_v35 = vsel %vm5032_vm5, %v4831_v21, %v888_v62  ;;  %3929 = vpow2.f32 %v3358_v13  ;;  %v3655_v42 = vmul.f32 -1.442695, %v4712_v47  ;;  %v5070_v13 = vpop.permute.xlu2 %2588  ;;  %v1253_v54 = vpop.permute.xlu1 %1252 }
 0x175   : > { %v3922_v22 = vpop.eup %3921  ;;  %v5044_v58 = vadd.f32 %v4602_v1, %v2185_v53  ;;  %v2319_v17 = vadd.f32 %v4891_v3, %v2318_v60  ;;  %vm2321_vm7 = vweird.f32 %v4891_v3  ;;  %3931 = vpow2.f32 %v3359_v29  ;;  %6317 = vst [vmem:[#allocation32_spill] sm:$0xff] %v5070_v13 }
 0x176   : > { %v5049_v25 = vpop.eup %3923  ;;  %2666 = vrot.lane.b32.xlu2 %v3922_v22, %s4141_s30  ;;  %v2327_v27 = vor.u32 1.1754944e-38, %v2326_v9  ;;  %v2331_v1 = vmul.f32 %v5020_v16, %v4919_v39  ;;  %v5058_v50 = vadd.f32 %v4597_v57, %v799_v46  ;;  %v5076_v57 = vsel %vm4975_vm15, %v4860_v32, %v892_v35  ;;  %vm5086_vm9 = vmor %vm2320_vm4, %vm2321_vm7 }
 0x177   : > { %v3926_v31 = vpop.eup %3925  ;;  %3933 = vtanh.f32 %v5044_v58  ;;  %v916_v29 = vsub.f32 1.0, %v915_v18  ;;  %v2308_v12 = vsel %vm5066_vm8, %v4872_v48, %v2304_v59  ;;  %v3656_v46 = vmul.f32 -1.442695, %v4729_v44 }
 0x178   : > { %v2639_v21 = vpop.permute.xlu0 %2638  ;;  %v5060_v62 = vpop.eup %3927  ;;  %v945_v32 = vmul.f32 %v5049_v25, %v4933_v63  ;;  %v930_v53 = vmul.f32 %v4985_v15, %v4893_v40  ;;  %v5095_v52 = vadd.f32 1.0, %v3918_v55  ;;  %3935 = vpow2.f32 %v3655_v42 }
 0x179   : > { %v2686_v60 = vmul.f32 %v2639_v21, %v4948_v56  ;;  %v2323_v51 = vsel %vm5086_vm9, %v4891_v3, %v2319_v17  ;;  %v2341_v48 = vand.u32 2147483648, %v4919_v39  ;;  %v5102_v18 = vadd.f32 1.0, %v3926_v31 }
 0x17a   : > { %v2332_v44 = vsub.f32 1.0, %v2331_v1  ;;  %v2346_v22 = vmul.f32 %v5060_v62, %v4950_v7  ;;  %3937 = vtanh.f32 %v5058_v50  ;;  %v3930_v59 = vpop.eup %3929  ;;  %v5110_v55 = vsel %vm4998_vm0, %v4980_v0, %v2308_v12 }
 0x17b   : > { %2718 = vrot.lane.b32.xlu1 %v2686_v60, %s4141_s30  ;;  %v5115_v3 = vsel %vm5014_vm2, %v4889_v34, %v907_v45  ;;  %v1300_v35 = vmul.f32 %v1253_v54, %v5076_v57  ;;  %v917_v42 = vmul.f32 %v4963_v38, %v916_v29  ;;  %v3932_v17 = vpop.eup %3931  ;;  %3939 = vpow2.f32 %v3656_v46 }
 0x17c   : > { %v2339_v31 = vand.u32 2147483647, %v4919_v39  ;;  %v946_v1 = vsub.f32 1.0, %v945_v32  ;;  %v931_v21 = vsub.f32 1.0, %v930_v53  ;;  %3941 = vrcp.f32 %v5095_v52 }
 0x17d   : > { %v3934_v47 = vpop.eup %3933  ;;  %v5123_v0 = vsel %vm5039_vm6, %v2327_v27, %v2323_v51  ;;  %v5125_v20 = vor.u32 1.1754944e-38, %v2341_v48  ;;  %v2356_v34 = vand.u32 2147483648, %v4950_v7  ;;  %v5129_v30 = vadd.f32 1.0, %v3930_v59 }
 0x17e   : > { %1332 = vrot.lane.b32.xlu2 %v1300_v35, %s4141_s30  ;;  %3943 = vrcp.f32 %v5102_v18  ;;  %v2333_v45 = vmul.f32 %v5020_v16, %v2332_v44  ;;  %v2347_v60 = vsub.f32 1.0, %v2346_v22  ;;  %2668 = vrot.lane.b32.xlu0 %v3934_v47, %s4141_s30  ;;  %v3936_v29 = vpop.eup %3935  ;;  %v5134_v12 = vadd.f32 1.0, %v3932_v17  ;;  %v1255_v44 = vpop.permute.xlu2 %1254 }
 0x17f   : > { %vm2335_vm10 = vweird.f32 %v4919_v39  ;;  %vm2336_vm11 = vweird.f32 %v5020_v16  ;;  %v918_v19 = vadd.f32 %v4963_v38, %v917_v42  ;;  %vm920_vm12 = vweird.f32 %v4963_v38 }
 0x180   : > { %v3938_v27 = vpop.eup %3937  ;;  %v2354_v9 = vand.u32 2147483647, %v4950_v7  ;;  %v947_v46 = vmul.f32 %v5049_v25, %v946_v1  ;;  %v2641_v54 = vpop.permute.xlu1 %2640  ;;  %v925_v32 = vand.u32 2147483648, %v4874_v24  ;;  %v932_v53 = vmul.f32 %v4985_v15, %v931_v21  ;;  %vm5210_vm7 = vmor %vm2335_vm10, %vm2336_vm11 }
 0x181   : > { %v3657_v51 = vmul.f32 -1.442695, %v4747_v2  ;;  %v5145_v48 = vor.u32 1.1754944e-38, %v2356_v34  ;;  %vm950_vm13 = vweird.f32 %v5049_v25  ;;  %vm919_vm14 = vweird.f32 %v4874_v24  ;;  %v3940_v59 = vpop.eup %3939 }
 0x182   : > { %v923_v22 = vand.u32 2147483647, %v4874_v24  ;;  %3945 = vrcp.f32 %v5129_v30  ;;  %v3360_v35 = vmul.f32 -1.442695, %v4724_v37  ;;  %v5154_v42 = vadd.f32 %v5020_v16, %v2333_v45  ;;  %vm5159_vm15 = vmor %vm919_vm14, %vm920_vm12  ;;  %v5163_v1 = vpop.eup %3941 }
 0x183   : > { %1282 = vrot.lane.b32.xlu1 %v3938_v27, %s4141_s30  ;;  %v2348_v2 = vmul.f32 %v5060_v62, %v2347_v60  ;;  %3947 = vrcp.f32 %v5134_v12  ;;  %v5166_v24 = vadd.f32 1.0, %v3936_v29  ;;  %vm949_vm0 = vweird.f32 %v4933_v63  ;;  %v1257_v60 = vpop.permute.xlu0 %1256 }
 0x184   : > { %v2687_v37 = vmul.f32 %v2641_v54, %v4994_v36  ;;  %v922_v21 = vsel %vm5159_vm15, %v4963_v38, %v918_v19  ;;  %v5173_v47 = vpop.eup %3943  ;;  %vm5175_vm1 = vcmp.eq.f32.partialorder %v2339_v31, 8.507059e+37  ;;  %vm2350_vm2 = vweird.f32 %v4950_v7  ;;  %vm5248_vm12 = vmor %vm949_vm0, %vm950_vm13 }
 0x185   : > { %v1301_v45 = vmul.f32 %v1255_v44, %v5115_v3  ;;  %v926_v29 = vor.u32 1.1754944e-38, %v925_v32  ;;  %v933_v27 = vadd.f32 %v4985_v15, %v932_v53  ;;  %vm935_vm3 = vweird.f32 %v4985_v15 }
 0x186   : > { %v5183_v54 = vadd.f32 1.0, %v3940_v59  ;;  %3949 = vpow2.f32 %v3657_v51  ;;  %vm924_vm4 = vcmp.eq.f32.partialorder %v923_v22, 8.507059e+37  ;;  %2720 = vrot.lane.b32.xlu2 %v2687_v37, %s4141_s30  ;;  %v940_v38 = vand.u32 2147483648, %v4893_v40 }
 0x187   : > { %v3362_v31 = vmul.f32 -1.442695, %v4756_v43  ;;  %v5188_v19 = vsel %vm924_vm4, %v926_v29, %v922_v21  ;;  %1334 = vrot.lane.b32.xlu0 %v1301_v45, %s4141_s30  ;;  %vm934_vm5 = vweird.f32 %v4893_v40  ;;  %v938_v32 = vand.u32 2147483647, %v4893_v40 }
 0x188   : > { %3951 = vpow2.f32 %v3360_v35  ;;  %v2361_v53 = vmul.f32 %v5173_v47, %v5102_v18  ;;  %v953_v51 = vand.u32 2147483647, %v4933_v63  ;;  %v1302_v44 = vmul.f32 %v1257_v60, %v5188_v19  ;;  %vm5199_vm6 = vmor %vm934_vm5, %vm935_vm3  ;;  %v5203_v22 = vpop.eup %3945 }
 0x189   : > { %3953 = vrcp.f32 %v5166_v24  ;;  %vm5214_vm8 = vcmp.eq.f32.partialorder %v2354_v9, 8.507059e+37  ;;  %v948_v35 = vadd.f32 %v5049_v25, %v947_v46  ;;  %v937_v17 = vsel %vm5199_vm6, %v4985_v15, %v933_v27  ;;  %v5224_v21 = vpop.eup %3947  ;;  %v2643_v9 = vpop.permute.xlu2 %2642 }
 0x18a   : > { %v960_v37 = vmul.f32 %v5163_v1, %v5095_v52  ;;  %3955 = vrcp.f32 %v5183_v54  ;;  %v2338_v39 = vsel %vm5210_vm7, %v5020_v16, %v5154_v42  ;;  %vm2351_vm9 = vweird.f32 %v5060_v62 }
 0x18b   : > { %1336 = vrot.lane.b32.xlu1 %v1302_v44, %s4141_s30  ;;  %v941_v46 = vor.u32 1.1754944e-38, %v940_v38  ;;  %v2349_v15 = vadd.f32 %v5060_v62, %v2348_v2  ;;  %v2371_v45 = vand.u32 2147483648, %v5102_v18  ;;  %3957 = vpow2.f32 %v3362_v31  ;;  %v1259_v43 = vpop.permute.xlu1 %1258  ;;  %vm5262_vm14 = vmor %vm2350_vm2, %vm2351_vm9 }
 0x18c   : > { %vm939_vm10 = vcmp.eq.f32.partialorder %v938_v32, 8.507059e+37  ;;  %v3950_v60 = vpop.eup %3949  ;;  %v2362_v29 = vsub.f32 1.0, %v2361_v53  ;;  %vm5235_vm11 = vcmp.eq.f32.partialorder %v953_v51, 8.507059e+37  ;;  %v955_v16 = vand.u32 2147483648, %v4933_v63 }
 0x18d   : > { %v5240_v42 = vsel %vm939_vm10, %v941_v46, %v937_v17  ;;  %v3361_v44 = vmul.f32 -1.442695, %v4740_v8  ;;  %v2688_v38 = vmul.f32 %v2643_v9, %v5110_v55  ;;  %v961_v32 = vsub.f32 1.0, %v960_v37 }
 0x18e   : > { %v1303_v31 = vmul.f32 %v1259_v43, %v5240_v42  ;;  %v3952_v53 = vpop.eup %3951  ;;  %v5256_v51 = vsel %vm5175_vm1, %v5125_v20, %v2338_v39  ;;  %vm2365_vm13 = vweird.f32 %v5102_v18  ;;  %v3659_v40 = vmul.f32 -1.442695, %v4796_v61 }
 0x18f   : > { %v5269_v17 = vpop.eup %3953  ;;  %v2353_v20 = vsel %vm5262_vm14, %v5060_v62, %v2349_v15  ;;  %v5274_v34 = vor.u32 1.1754944e-38, %v2371_v45  ;;  %v3658_v7 = vmul.f32 -1.442695, %v4765_v10  ;;  %v952_v37 = vsel %vm5248_vm12, %v5049_v25, %v948_v35  ;;  %2722 = vrot.lane.b32.xlu0 %v2688_v38, %s4141_s30 }
 0x190   : > { %1338 = vrot.lane.b32.xlu2 %v1303_v31, %s4141_s30  ;;  %v5282_v39 = vpop.eup %3955  ;;  %v5284_v61 = vadd.f32 1.0, %v3950_v60  ;;  %v2363_v9 = vmul.f32 %v5173_v47, %v2362_v29  ;;  %v956_v46 = vor.u32 1.1754944e-38, %v955_v16  ;;  %v2645_v62 = vpop.permute.xlu0 %2644  ;;  %v990_v15 = vmul.f32 %v5224_v21, %v5134_v12 }
 0x191   : > { %v3958_v10 = vpop.eup %3957  ;;  %3959 = vpow2.f32 %v3361_v44  ;;  %v2689_v45 = vmul.f32 %v2645_v62, %v5123_v0  ;;  %v962_v25 = vmul.f32 %v5163_v1, %v961_v32  ;;  %v975_v35 = vmul.f32 %v5203_v22, %v5129_v30  ;;  %v1261_v16 = vpop.permute.xlu2 %1260 }
 0x192   : > { %v5293_v43 = vadd.f32 1.0, %v3952_v53  ;;  %v5298_v60 = vsel %vm5214_vm8, %v5145_v48, %v2353_v20  ;;  %3961 = vpow2.f32 %v3659_v40  ;;  %v2376_v29 = vmul.f32 %v5269_v17, %v5166_v24 }
 0x193   : > { %6336 = vst [vmem:[#allocation33_spill] sm:$0xff] %v5298_v60  ;;  %vm2366_vm15 = vweird.f32 %v5173_v47  ;;  %3963 = vpow2.f32 %v3658_v7  ;;  %v2391_v44 = vmul.f32 %v5282_v39, %v5183_v54  ;;  %v5307_v38 = vsel %vm5235_vm11, %v956_v46, %v952_v37  ;;  %2724 = vrot.lane.b32.xlu1 %v2689_v45, %s4141_s30 }
 0x194   : > { %3965 = vrcp.f32 %v5284_v61  ;;  %v5312_v48 = vadd.f32 %v5173_v47, %v2363_v9  ;;  %v5314_v59 = vadd.f32 1.0, %v3958_v10  ;;  %v991_v2 = vsub.f32 1.0, %v990_v15  ;;  %vm5326_vm1 = vmor %vm2365_vm13, %vm2366_vm15 }
 0x195   : > { %v1304_v31 = vmul.f32 %v1261_v16, %v5307_v38  ;;  %v963_v32 = vadd.f32 %v5163_v1, %v962_v25  ;;  %vm965_vm0 = vweird.f32 %v5163_v1  ;;  %v976_v53 = vsub.f32 1.0, %v975_v35 }
 0x196   : > { %3967 = vrcp.f32 %v5293_v43  ;;  %v2377_v27 = vsub.f32 1.0, %v2376_v29  ;;  %v970_v40 = vand.u32 2147483648, %v5095_v52  ;;  %v2392_v37 = vsub.f32 1.0, %v2391_v44 }
 0x197   : > { %v3960_v20 = vpop.eup %3959  ;;  %v3365_v9 = vmul.f32 -1.442695, %v4849_v28  ;;  %1340 = vrot.lane.b32.xlu0 %v1304_v31, %s4141_s30  ;;  %vm964_vm2 = vweird.f32 %v5095_v52  ;;  %v968_v46 = vand.u32 2147483647, %v5095_v52  ;;  %3969 = vrcp.f32 %v5314_v59 }
 0x198   : > { %v3962_v62 = vpop.eup %3961  ;;  %v992_v45 = vmul.f32 %v5224_v21, %v991_v2  ;;  %v2647_v25 = vpop.permute.xlu1 %2646  ;;  %vm5343_vm3 = vmor %vm964_vm2, %vm965_vm0  ;;  %v977_v44 = vmul.f32 %v5203_v22, %v976_v53  ;;  %v5355_v2 = vadd.f32 1.0, %v3960_v20  ;;  %v3363_v10 = vmul.f32 -1.442695, %v4782_v33 }
 0x199   : > { %v3964_v52 = vpop.eup %3963  ;;  %v2690_v29 = vmul.f32 %v2647_v25, %v5256_v51  ;;  %v967_v16 = vsel %vm5343_vm3, %v5163_v1, %v963_v32  ;;  %v2378_v15 = vmul.f32 %v5269_v17, %v2377_v27  ;;  %vm2381_vm4 = vweird.f32 %v5269_v17  ;;  %v2649_v8 = vpop.permute.xlu2 %2648 }
 0x19a   : > { %v5353_v31 = vpop.eup %3965  ;;  %v971_v35 = vor.u32 1.1754944e-38, %v970_v40  ;;  %v5360_v63 = vadd.f32 1.0, %v3962_v62  ;;  %v2393_v25 = vmul.f32 %v5282_v39, %v2392_v37  ;;  %3971 = vpow2.f32 %v3365_v9 }
 0x19b   : > { %2726 = vrot.lane.b32.xlu2 %v2690_v29, %s4141_s30  ;;  %vm969_vm5 = vcmp.eq.f32.partialorder %v968_v46, 8.507059e+37  ;;  %v5366_v32 = vadd.f32 1.0, %v3964_v52  ;;  %vm2380_vm6 = vweird.f32 %v5166_v24  ;;  %v993_v33 = vadd.f32 %v5224_v21, %v992_v45  ;;  %v1263_v27 = vpop.permute.xlu0 %1262 }
 0x19c   : > { %v5364_v1 = vpop.eup %3967  ;;  %vm995_vm7 = vweird.f32 %v5224_v21  ;;  %v5371_v53 = vsel %vm969_vm5, %v971_v35, %v967_v16  ;;  %v6342_v40 = vand.u32 2147483647, %v5102_v18  ;;  %vm2395_vm9 = vweird.f32 %v5183_v54  ;;  %vm5443_vm5 = vmor %vm2380_vm6, %vm2381_vm4 }
 0x19d   : > { %6341 = vst [vmem:[#allocation34_spill] sm:$0xff] %v5371_v53  ;;  %v2691_v37 = vmul.f32 %v2649_v8, %v5298_v60  ;;  %v1305_v9 = vmul.f32 %v1263_v27, %v5371_v53  ;;  %v978_v46 = vadd.f32 %v5203_v22, %v977_v44  ;;  %vm980_vm10 = vweird.f32 %v5203_v22  ;;  %v5384_v62 = vpop.eup %3969 }
 0x19e   : > { %vm5375_vm8 = vcmp.eq.f32.partialorder %v6342_v40, 8.507059e+37  ;;  %v2406_v45 = vmul.f32 %v5353_v31, %v5284_v61  ;;  %vm994_vm11 = vweird.f32 %v5134_v12  ;;  %v1000_v18 = vand.u32 2147483648, %v5134_v12 }
 0x19f   : > { %v985_v28 = vand.u32 2147483648, %v5129_v30  ;;  %3973 = vrcp.f32 %v5360_v63  ;;  %vm5394_vm12 = vmor %vm994_vm11, %vm995_vm7  ;;  %v998_v52 = vand.u32 2147483647, %v5134_v12  ;;  %2728 = vrot.lane.b32.xlu0 %v2691_v37, %s4141_s30  ;;  %1342 = vrot.lane.b32.xlu1 %v1305_v9, %s4141_s30  ;;  %vm979_vm14 = vweird.f32 %v5129_v30 }
 0x1a0   : > { %v983_v35 = vand.u32 2147483647, %v5129_v30  ;;  %3975 = vrcp.f32 %v5355_v2  ;;  %v2379_v29 = vadd.f32 %v5269_v17, %v2378_v15  ;;  %vm2396_vm13 = vweird.f32 %v5282_v39  ;;  %vm5408_vm15 = vmor %vm979_vm14, %vm980_vm10  ;;  %v3972_v44 = vpop.eup %3971 }
 0x1a1   : > { %v1005_v12 = vmul.f32 %v5364_v1, %v5293_v43  ;;  %3977 = vpow2.f32 %v3363_v10  ;;  %v6349_v27 = vand.u32 2147483647, %v5166_v24  ;;  %v997_v15 = vsel %vm5394_vm12, %v5224_v21, %v993_v33  ;;  %vm5468_vm4 = vmor %vm2395_vm9, %vm2396_vm13 }
 0x1a2   : > { %v982_v40 = vsel %vm5408_vm15, %v5203_v22, %v978_v46  ;;  %v1035_v37 = vmul.f32 %v5384_v62, %v5314_v59  ;;  %3979 = vrcp.f32 %v5366_v32  ;;  %v3662_v10 = vmul.f32 -1.442695, %v4938_v4 }
 0x1a3   : > { %vm5416_vm0 = vcmp.eq.f32.partialorder %v6349_v27, 8.507059e+37  ;;  %v1001_v9 = vor.u32 1.1754944e-38, %v1000_v18  ;;  %v1267_v27 = vpop.permute.xlu2 %1266  ;;  %v986_v13 = vor.u32 1.1754944e-38, %v985_v28  ;;  %v2407_v53 = vsub.f32 1.0, %v2406_v45  ;;  %v1265_v46 = vpop.permute.xlu1 %1264 }
 0x1a4   : > { %v2394_v60 = vadd.f32 %v5282_v39, %v2393_v25  ;;  %vm999_vm2 = vcmp.eq.f32.partialorder %v998_v52, 8.507059e+37  ;;  %vm984_vm3 = vcmp.eq.f32.partialorder %v983_v35, 8.507059e+37  ;;  %v5431_v21 = vadd.f32 1.0, %v3972_v44 }
 0x1a5   : > { %v5433_v33 = vsel %vm999_vm2, %v1001_v9, %v997_v15  ;;  %v5435_v22 = vsel %vm984_vm3, %v986_v13, %v982_v40  ;;  %v1006_v8 = vsub.f32 1.0, %v1005_v12  ;;  %v5437_v16 = vpop.eup %3973  ;;  %v3364_v25 = vmul.f32 -1.442695, %v4807_v26 }
 0x1a6   : > { %v1307_v45 = vmul.f32 %v1267_v27, %v5433_v33  ;;  %v1306_v18 = vmul.f32 %v1265_v46, %v5435_v22  ;;  %v1036_v13 = vsub.f32 1.0, %v1035_v37  ;;  %v5450_v28 = vpop.eup %3975  ;;  %v6354_v52 = vsel %vm5326_vm1, %v5173_v47, %v5312_v48 }
 0x1a7   : > { %v5460_v35 = vsel %vm5375_vm8, %v5274_v34, %v6354_v52  ;;  %v6355_v12 = vand.u32 2147483648, %v5166_v24  ;;  %v2399_v7 = vand.u32 2147483647, %v5183_v54  ;;  %3981 = vpow2.f32 %v3662_v10  ;;  %v3978_v47 = vpop.eup %3977 }
 0x1a8   : > { %v2408_v48 = vmul.f32 %v5353_v31, %v2407_v53  ;;  %v2383_v34 = vsel %vm5443_vm5, %v5269_v17, %v2379_v29  ;;  %v2398_v24 = vsel %vm5468_vm4, %v5282_v39, %v2394_v60  ;;  %v6358_v20 = vand.u32 2147483648, %v5183_v54  ;;  %1346 = vrot.lane.b32.xlu0 %v1307_v45, %s4141_s30  ;;  %1344 = vrot.lane.b32.xlu2 %v1306_v18, %s4141_s30  ;;  %v5484_v40 = vpop.eup %3979  ;;  %v2651_v53 = vpop.permute.xlu0 %2650 }
 0x1a9   : > { %v2387_v26 = vor.u32 1.1754944e-38, %v6355_v12  ;;  %v3660_v37 = vmul.f32 -1.442695, %v4824_v14  ;;  %3983 = vrcp.f32 %v5431_v21  ;;  %v2436_v17 = vmul.f32 %v5437_v16, %v5360_v63 }
 0x1aa   : > { %v2402_v15 = vor.u32 1.1754944e-38, %v6358_v20  ;;  %v1007_v29 = vmul.f32 %v5364_v1, %v1006_v8  ;;  %3985 = vpow2.f32 %v3364_v25  ;;  %v2692_v54 = vmul.f32 %v2651_v53, %v5460_v35 }
 0x1ab   : > { %v1037_v39 = vmul.f32 %v5384_v62, %v1036_v13  ;;  %v1020_v60 = vmul.f32 %v5450_v28, %v5355_v2  ;;  %v2414_v10 = vand.u32 2147483647, %v5284_v61  ;;  %v2416_v14 = vand.u32 2147483648, %v5284_v61  ;;  %v2655_v27 = vpop.permute.xlu2 %2654 }
 0x1ac   : > { %v5499_v9 = vsel %vm5416_vm0, %v2387_v26, %v2383_v34  ;;  %vm2400_vm1 = vcmp.eq.f32.partialorder %v2399_v7, 8.507059e+37  ;;  %v5502_v46 = vadd.f32 %v5353_v31, %v2408_v48  ;;  %vm2411_vm6 = vweird.f32 %v5353_v31  ;;  %2730 = vrot.lane.b32.xlu1 %v2692_v54, %s4141_s30 }
 0x1ad   : > { %v5505_v8 = vadd.f32 1.0, %v3978_v47  ;;  %v5507_v4 = vsel %vm2400_vm1, %v2402_v15, %v2398_v24  ;;  %v5511_v25 = vmul.f32 %v5484_v40, %v5366_v32  ;;  %v3982_v30 = vpop.eup %3981  ;;  %3987 = vpow2.f32 %v3660_v37 }
 0x1ae   : > { %v2437_v45 = vsub.f32 1.0, %v2436_v17  ;;  %v1008_v18 = vadd.f32 %v5364_v1, %v1007_v29  ;;  %vm1010_vm7 = vweird.f32 %v5364_v1  ;;  %vm2410_vm8 = vweird.f32 %v5284_v61 }
 0x1af   : > { %v2694_v13 = vmul.f32 %v2655_v27, %v5507_v4  ;;  %v1038_v52 = vadd.f32 %v5384_v62, %v1037_v39  ;;  %vm1040_vm9 = vweird.f32 %v5384_v62  ;;  %v1021_v12 = vsub.f32 1.0, %v1020_v60  ;;  %v5520_v26 = vpop.eup %3983  ;;  %vm5577_vm3 = vmor %vm2410_vm8, %vm2411_vm6 }
 0x1b0   : > { %v3661_v44 = vmul.f32 -1.442695, %v4865_v23  ;;  %v1045_v7 = vand.u32 2147483648, %v5314_v59  ;;  %vm1009_vm10 = vweird.f32 %v5293_v43  ;;  %v1015_v47 = vand.u32 2147483648, %v5293_v43  ;;  %v3986_v48 = vpop.eup %3985  ;;  %v2653_v17 = vpop.permute.xlu1 %2652 }
 0x1b1   : > { %v5526_v34 = vadd.f32 1.0, %v3982_v30  ;;  %vm1039_vm11 = vweird.f32 %v5314_v59  ;;  %v1043_v24 = vand.u32 2147483647, %v5314_v59  ;;  %2734 = vrot.lane.b32.xlu0 %v2694_v13, %s4141_s30  ;;  %vm5533_vm12 = vmor %vm1009_vm10, %vm1010_vm7  ;;  %v1013_v23 = vand.u32 2147483647, %v5293_v43 }
 0x1b2   : > { %3989 = vrcp.f32 %v5505_v8  ;;  %v2438_v15 = vmul.f32 %v5437_v16, %v2437_v45  ;;  %v2422_v37 = vsub.f32 1.0, %v5511_v25  ;;  %vm5543_vm14 = vmor %vm1039_vm11, %vm1040_vm9  ;;  %v1012_v53 = vsel %vm5533_vm12, %v5364_v1, %v1008_v18 }
 0x1b3   : > { %v1042_v43 = vsel %vm5543_vm14, %v5384_v62, %v1038_v52  ;;  %v2693_v29 = vmul.f32 %v2653_v17, %v5499_v9  ;;  %v1022_v54 = vmul.f32 %v5450_v28, %v1021_v12  ;;  %v1080_v39 = vmul.f32 %v5520_v26, %v5431_v21  ;;  %v3988_v60 = vpop.eup %3987  ;;  %v1273_v30 = vpop.permute.xlu2 %1272 }
 0x1b4   : > { %v5557_v27 = vadd.f32 1.0, %v3986_v48  ;;  %3991 = vpow2.f32 %v3661_v44  ;;  %v1046_v25 = vor.u32 1.1754944e-38, %v1045_v7  ;;  %v1016_v45 = vor.u32 1.1754944e-38, %v1015_v47  ;;  %v1269_v13 = vpop.permute.xlu0 %1268 }
 0x1b5   : > { %vm2441_vm13 = vweird.f32 %v5437_v16  ;;  %3993 = vrcp.f32 %v5526_v34  ;;  %vm1044_vm15 = vcmp.eq.f32.partialorder %v1043_v24, 8.507059e+37  ;;  %2732 = vrot.lane.b32.xlu2 %v2693_v29, %s4141_s30  ;;  %vm1014_vm0 = vcmp.eq.f32.partialorder %v1013_v23, 8.507059e+37 }
 0x1b6   : > { %v2439_v1 = vadd.f32 %v5437_v16, %v2438_v15  ;;  %v5563_v62 = vsel %vm1044_vm15, %v1046_v25, %v1042_v43  ;;  %v5565_v18 = vsel %vm1014_vm0, %v1016_v45, %v1012_v53  ;;  %vm1025_vm2 = vweird.f32 %v5450_v28 }
 0x1b7   : > { %v1310_v52 = vmul.f32 %v1273_v30, %v5563_v62  ;;  %v1308_v12 = vmul.f32 %v1269_v13, %v5565_v18  ;;  %v1023_v44 = vadd.f32 %v5450_v28, %v1022_v54  ;;  %v1081_v7 = vsub.f32 1.0, %v1080_v39 }
 0x1b8   : > { %v5571_v47 = vpop.eup %3989  ;;  %vm2440_vm5 = vweird.f32 %v5360_v63  ;;  %v2444_v24 = vand.u32 2147483647, %v5360_v63  ;;  %v2446_v20 = vand.u32 2147483648, %v5360_v63  ;;  %v1030_v23 = vand.u32 2147483648, %v5355_v2 }
 0x1b9   : > { %v5585_v15 = vadd.f32 1.0, %v3988_v60  ;;  %vm5589_vm4 = vmor %vm2440_vm5, %vm2441_vm13  ;;  %v2423_v17 = vmul.f32 %v5484_v40, %v2422_v37  ;;  %1352 = vrot.lane.b32.xlu0 %v1310_v52, %s4141_s30  ;;  %1348 = vrot.lane.b32.xlu1 %v1308_v12, %s4141_s30  ;;  %vm1024_vm1 = vweird.f32 %v5355_v2  ;;  %v1028_v63 = vand.u32 2147483647, %v5355_v2 }
 0x1ba   : > { %v3992_v53 = vpop.eup %3991  ;;  %v2417_v43 = vor.u32 1.1754944e-38, %v2416_v14  ;;  %3995 = vrcp.f32 %v5557_v27  ;;  %vm2425_vm6 = vweird.f32 %v5366_v32  ;;  %v3366_v29 = vmul.f32 -1.442695, %v4916_v11  ;;  %vm5605_vm7 = vmor %vm1024_vm1, %vm1025_vm2 }
 0x1bb   : > { %v5609_v54 = vpop.eup %3993  ;;  %v2413_v2 = vsel %vm5577_vm3, %v5353_v31, %v5502_v46  ;;  %v2443_v14 = vsel %vm5589_vm4, %v5437_v16, %v2439_v1  ;;  %v1027_v11 = vsel %vm5605_vm7, %v5450_v28, %v1023_v44  ;;  %v1082_v39 = vmul.f32 %v5520_v26, %v1081_v7  ;;  %v2661_v46 = vpop.permute.xlu2 %2660 }
 0x1bc   : > { %vm2445_vm8 = vcmp.eq.f32.partialorder %v2444_v24, 8.507059e+37  ;;  %v2447_v60 = vor.u32 1.1754944e-38, %v2446_v20  ;;  %v1031_v25 = vor.u32 1.1754944e-38, %v1030_v23  ;;  %v1050_v30 = vmul.f32 %v5571_v47, %v5505_v8  ;;  %v1271_v1 = vpop.permute.xlu1 %1270 }
 0x1bd   : > { %3997 = vrcp.f32 %v5585_v15  ;;  %v2424_v31 = vadd.f32 %v5484_v40, %v2423_v17  ;;  %vm2426_vm9 = vweird.f32 %v5484_v40  ;;  %vm1029_vm10 = vcmp.eq.f32.partialorder %v1028_v63, 8.507059e+37 }
 0x1be   : > { %v5627_v16 = vsel %vm2445_vm8, %v2447_v60, %v2443_v14  ;;  %3999 = vpow2.f32 %v3366_v29  ;;  %v2481_v28 = vmul.f32 %v5609_v54, %v5526_v34  ;;  %v5631_v45 = vsel %vm1029_vm10, %v1031_v25, %v1027_v11  ;;  %vm5649_vm14 = vmor %vm2425_vm6, %vm2426_vm9 }
 0x1bf   : > { %v2697_v13 = vmul.f32 %v2661_v46, %v5627_v16  ;;  %v1309_v52 = vmul.f32 %v1271_v1, %v5631_v45  ;;  %v1083_v12 = vadd.f32 %v5520_v26, %v1082_v39  ;;  %vm1085_vm11 = vweird.f32 %v5520_v26 }
 0x1c0   : > { %v5637_v44 = vpop.eup %3995  ;;  %v5639_v7 = vadd.f32 1.0, %v3992_v53  ;;  %v2431_v48 = vand.u32 2147483648, %v5366_v32  ;;  %v1090_v24 = vand.u32 2147483648, %v5431_v21  ;;  %v1051_v20 = vsub.f32 1.0, %v1050_v30  ;;  %v2657_v63 = vpop.permute.xlu0 %2656 }
 0x1c1   : > { %vm2415_vm12 = vcmp.eq.f32.partialorder %v2414_v10, 8.507059e+37  ;;  %v2429_v59 = vand.u32 2147483647, %v5366_v32  ;;  %2740 = vrot.lane.b32.xlu0 %v2697_v13, %s4141_s30  ;;  %1350 = vrot.lane.b32.xlu2 %v1309_v52, %s4141_s30  ;;  %vm1084_vm13 = vweird.f32 %v5431_v21  ;;  %v1088_v17 = vand.u32 2147483647, %v5431_v21 }
 0x1c2   : > { %v5658_v61 = vsel %vm2415_vm12, %v2417_v43, %v2413_v2  ;;  %v2428_v10 = vsel %vm5649_vm14, %v5484_v40, %v2424_v31  ;;  %vm5665_vm15 = vmor %vm1084_vm13, %vm1085_vm11  ;;  %v2482_v29 = vsub.f32 1.0, %v2481_v28  ;;  %v1065_v43 = vmul.f32 %v5637_v44, %v5557_v27 }
 0x1c3   : > { %v5669_v32 = vpop.eup %3997  ;;  %v2695_v37 = vmul.f32 %v2657_v63, %v5658_v61  ;;  %v1087_v21 = vsel %vm5665_vm15, %v5520_v26, %v1083_v12  ;;  %4001 = vrcp.f32 %v5639_v7  ;;  %v2432_v2 = vor.u32 1.1754944e-38, %v2431_v48 }
 0x1c4   : > { %v4000_v40 = vpop.eup %3999  ;;  %v1091_v14 = vor.u32 1.1754944e-38, %v1090_v24  ;;  %v1052_v11 = vmul.f32 %v5571_v47, %v1051_v20  ;;  %vm2430_vm0 = vcmp.eq.f32.partialorder %v2429_v59, 8.507059e+37  ;;  %vm1089_vm2 = vcmp.eq.f32.partialorder %v1088_v17, 8.507059e+37 }
 0x1c5   : > { %2736 = vrot.lane.b32.xlu1 %v2695_v37, %s4141_s30  ;;  %v5680_v39 = vsel %vm2430_vm0, %v2432_v2, %v2428_v10  ;;  %v3663_v60 = vmul.f32 -1.442695, %v5044_v58  ;;  %v1279_v26 = vpop.permute.xlu2 %1278  ;;  %v2451_v30 = vmul.f32 %v5669_v32, %v5585_v15  ;;  %v5687_v31 = vadd.f32 1.0, %v4000_v40 }
 0x1c6   : > { %v5683_v25 = vsel %vm1089_vm2, %v1091_v14, %v1087_v21  ;;  %v2483_v46 = vmul.f32 %v5609_v54, %v2482_v29  ;;  %v1066_v1 = vsub.f32 1.0, %v1065_v43  ;;  %vm2485_vm3 = vweird.f32 %v5526_v34 }
 0x1c7   : > { %v1313_v28 = vmul.f32 %v1279_v26, %v5683_v25  ;;  %v3367_v13 = vmul.f32 -1.442695, %v5058_v50  ;;  %v1053_v52 = vadd.f32 %v5571_v47, %v1052_v11  ;;  %vm1055_vm5 = vweird.f32 %v5571_v47 }
 0x1c8   : > { %vm2486_vm4 = vweird.f32 %v5609_v54  ;;  %v2489_v58 = vand.u32 2147483647, %v5526_v34  ;;  %v2491_v12 = vand.u32 2147483648, %v5526_v34  ;;  %v1060_v48 = vand.u32 2147483648, %v5505_v8  ;;  %v2659_v20 = vpop.permute.xlu1 %2658 }
 0x1c9   : > { %1358 = vrot.lane.b32.xlu0 %v1313_v28, %s4141_s30  ;;  %v5700_v24 = vpop.eup %4001  ;;  %4003 = vpow2.f32 %v3663_v60  ;;  %vm1054_vm1 = vweird.f32 %v5505_v8  ;;  %v1058_v50 = vand.u32 2147483647, %v5505_v8  ;;  %v2452_v23 = vsub.f32 1.0, %v2451_v30  ;;  %vm5714_vm7 = vmor %vm2485_vm3, %vm2486_vm4 }
 0x1ca   : > { %4005 = vrcp.f32 %v5687_v31  ;;  %v2484_v59 = vadd.f32 %v5609_v54, %v2483_v46  ;;  %v2696_v17 = vmul.f32 %v2659_v20, %v5680_v39  ;;  %vm1056_vm6 = vmor %vm1054_vm1, %vm1055_vm5  ;;  %v1067_v10 = vmul.f32 %v5637_v44, %v1066_v1 }
 0x1cb   : > { %v1057_v8 = vsel %vm1056_vm6, %v5571_v47, %v1053_v52  ;;  %v2466_v53 = vmul.f32 %v5700_v24, %v5639_v7  ;;  %4007 = vpow2.f32 %v3367_v13  ;;  %v1061_v29 = vor.u32 1.1754944e-38, %v1060_v48 }
 0x1cc   : > { %2738 = vrot.lane.b32.xlu2 %v2696_v17, %s4141_s30  ;;  %vm2490_vm8 = vcmp.eq.f32.partialorder %v2489_v58, 8.507059e+37  ;;  %v2492_v37 = vor.u32 1.1754944e-38, %v2491_v12  ;;  %vm1059_vm9 = vcmp.eq.f32.partialorder %v1058_v50, 8.507059e+37  ;;  %v2453_v21 = vmul.f32 %v5669_v32, %v2452_v23  ;;  %v1275_v40 = vpop.permute.xlu0 %1274 }
 0x1cd   : > { %v2488_v34 = vsel %vm5714_vm7, %v5609_v54, %v2484_v59  ;;  %v5726_v43 = vsel %vm1059_vm9, %v1061_v29, %v1057_v8  ;;  %v1068_v47 = vadd.f32 %v5637_v44, %v1067_v10  ;;  %vm1070_vm10 = vweird.f32 %v5637_v44 }
 0x1ce   : > { %v1311_v14 = vmul.f32 %v1275_v40, %v5726_v43  ;;  %v1075_v11 = vand.u32 2147483648, %v5557_v27  ;;  %vm1069_vm11 = vweird.f32 %v5557_v27  ;;  %v1073_v26 = vand.u32 2147483647, %v5557_v27 }
 0x1cf   : > { %v4004_v2 = vpop.eup %4003  ;;  %v5736_v30 = vsel %vm2490_vm8, %v2492_v37, %v2488_v34  ;;  %v2467_v54 = vsub.f32 1.0, %v2466_v53  ;;  %vm5739_vm12 = vmor %vm1069_vm11, %vm1070_vm10  ;;  %v2454_v1 = vadd.f32 %v5669_v32, %v2453_v21  ;;  %vm2456_vm14 = vweird.f32 %v5669_v32 }
 0x1d0   : > { %v5732_v60 = vpop.eup %4005  ;;  %v2667_v46 = vpop.permute.xlu2 %2666  ;;  %1354 = vrot.lane.b32.xlu1 %v1311_v14, %s4141_s30  ;;  %v5745_v52 = vadd.f32 1.0, %v4004_v2  ;;  %v1072_v27 = vsel %vm5739_vm12, %v5637_v44, %v1068_v47  ;;  %v2461_v12 = vand.u32 2147483648, %v5585_v15  ;;  %v1076_v48 = vor.u32 1.1754944e-38, %v1075_v11 }
 0x1d1   : > { %v4008_v13 = vpop.eup %4007  ;;  %v2700_v58 = vmul.f32 %v2667_v46, %v5736_v30  ;;  %vm2455_vm13 = vweird.f32 %v5585_v15  ;;  %v2459_v20 = vand.u32 2147483647, %v5585_v15  ;;  %v1095_v50 = vmul.f32 %v5732_v60, %v5687_v31 }
 0x1d2   : > { %vm1074_vm15 = vcmp.eq.f32.partialorder %v1073_v26, 8.507059e+37  ;;  %vm2457_vm0 = vmor %vm2455_vm13, %vm2456_vm14  ;;  %v5757_v23 = vadd.f32 1.0, %v4008_v13  ;;  %v2468_v10 = vmul.f32 %v5700_v24, %v2467_v54  ;;  %4009 = vrcp.f32 %v5745_v52 }
 0x1d3   : > { %2746 = vrot.lane.b32.xlu0 %v2700_v58, %s4141_s30  ;;  %v5759_v59 = vsel %vm1074_vm15, %v1076_v48, %v1072_v27  ;;  %v1277_v17 = vpop.permute.xlu1 %1276  ;;  %v2458_v44 = vsel %vm2457_vm0, %v5669_v32, %v2454_v1  ;;  %v2462_v63 = vor.u32 1.1754944e-38, %v2461_v12  ;;  %vm2460_vm2 = vcmp.eq.f32.partialorder %v2459_v20, 8.507059e+37 }
 0x1d4   : > { %v1312_v15 = vmul.f32 %v1277_v17, %v5759_v59  ;;  %v1096_v8 = vsub.f32 1.0, %v1095_v50  ;;  %v1220_v37 = vmul.f32 %v4637_v41, %v5076_v57  ;;  %4011 = vrcp.f32 %v5757_v23 }
 0x1d5   : > { %v5765_v53 = vsel %vm2460_vm2, %v2462_v63, %v2458_v44  ;;  %v2469_v34 = vadd.f32 %v5700_v24, %v2468_v10  ;;  %vm2471_vm3 = vweird.f32 %v5700_v24  ;;  %v2476_v47 = vand.u32 2147483648, %v5639_v7 }
 0x1d6   : > { %1356 = vrot.lane.b32.xlu2 %v1312_v15, %s4141_s30  ;;  %v1097_v2 = vmul.f32 %v5732_v60, %v1096_v8  ;;  %vm2470_vm5 = vweird.f32 %v5639_v7  ;;  %v2474_v14 = vand.u32 2147483647, %v5639_v7  ;;  %vm1100_vm1 = vweird.f32 %v5732_v60 }
 0x1d7   : > { %vm2472_vm4 = vmor %vm2470_vm5, %vm2471_vm3  ;;  %v2477_v54 = vor.u32 1.1754944e-38, %v2476_v47  ;;  %v2607_v1 = vmul.f32 %v4761_v49, %v4994_v36  ;;  %v1105_v7 = vand.u32 2147483648, %v5687_v31  ;;  %vm1099_vm7 = vweird.f32 %v5687_v31 }
 0x1d8   : > { %v2663_v29 = vpop.permute.xlu0 %2662  ;;  %v1333_v21 = vpop.permute.xlu2 %1332  ;;  %v2473_v11 = vsel %vm2472_vm4, %v5700_v24, %v2469_v34  ;;  %v1098_v46 = vadd.f32 %v5732_v60, %v1097_v2  ;;  %vm2475_vm6 = vcmp.eq.f32.partialorder %v2474_v14, 8.507059e+37  ;;  %v1103_v27 = vand.u32 2147483647, %v5687_v31  ;;  %vm1101_vm8 = vmor %vm1099_vm7, %vm1100_vm1 }
 0x1d9   : > { %v2698_v32 = vmul.f32 %v2663_v29, %v5765_v53  ;;  %v5774_v40 = vadd.f32 %v1333_v21, %v1220_v37  ;;  %v5779_v41 = vpop.eup %4009  ;;  %v5794_v13 = vsel %vm2475_vm6, %v2477_v54, %v2473_v11  ;;  %v1106_v44 = vor.u32 1.1754944e-38, %v1105_v7 }
 0x1da   : > { %v5785_v26 = vpop.eup %4011  ;;  %v2496_v28 = vmul.f32 %v5779_v41, %v5745_v52  ;;  %v1102_v50 = vsel %vm1101_vm8, %v5732_v60, %v1098_v46  ;;  %vm1104_vm9 = vcmp.eq.f32.partialorder %v1103_v27, 8.507059e+37  ;;  %v1223_v60 = vmul.f32 %v4684_v6, %v5240_v42 }
 0x1db   : > { %2742 = vrot.lane.b32.xlu1 %v2698_v32, %s4141_s30  ;;  %4013 = vtanh.f32 %v5774_v40  ;;  %v1110_v49 = vmul.f32 %v5785_v26, %v5757_v23  ;;  %v5807_v31 = vsel %vm1104_vm9, %v1106_v44, %v1102_v50  ;;  %vm2500_vm10 = vweird.f32 %v5745_v52  ;;  %v6378_v44 = vld [vmem:[#allocation6_spill] sm:$0xff] }
 0x1dc   : > { %v2497_v17 = vsub.f32 1.0, %v2496_v28  ;;  %vm2501_vm11 = vweird.f32 %v5779_v41  ;;  %v2506_v32 = vand.u32 2147483648, %v5745_v52  ;;  %v2504_v2 = vand.u32 2147483647, %v5745_v52 }
 0x1dd   : > { %v1111_v15 = vsub.f32 1.0, %v1110_v49  ;;  %vm2502_vm12 = vmor %vm2500_vm10, %vm2501_vm11  ;;  %vm1115_vm14 = vweird.f32 %v5785_v26  ;;  %v1120_v46 = vand.u32 2147483648, %v5757_v23  ;;  %vm1114_vm15 = vweird.f32 %v5757_v23 }
 0x1de   : > { %v2498_v8 = vmul.f32 %v5779_v41, %v2497_v17  ;;  %v2507_v14 = vor.u32 1.1754944e-38, %v2506_v32  ;;  %vm2505_vm13 = vcmp.eq.f32.partialorder %v2504_v2, 8.507059e+37  ;;  %v1118_v28 = vand.u32 2147483647, %v5757_v23  ;;  %vm1116_vm0 = vmor %vm1114_vm15, %vm1115_vm14  ;;  %v6377_v23 = vld [vmem:[#allocation21_spill] sm:$0xff] }
 0x1df   : > { %v1112_v21 = vmul.f32 %v5785_v26, %v1111_v15  ;;  %v2606_v52 = vmul.f32 %v4758_v5, %v4948_v56  ;;  %vm1556_vm3 = vcmask 261120   ;;  %vm1573_vm5 = vcmask 523264  }
 0x1e0   : > { %v2665_v58 = vpop.permute.xlu1 %2664  ;;  %v2721_v24 = vpop.permute.xlu2 %2720  ;;  %v2499_v47 = vadd.f32 %v5779_v41, %v2498_v8  ;;  %vm1119_vm2 = vcmp.eq.f32.partialorder %v1118_v28, 8.507059e+37  ;;  %v6379_v8 = vld [vmem:[#allocation7_spill] sm:$0xff] }
 0x1e1   : > { %v4014_v12 = vpop.eup %4013  ;;  %v2699_v48 = vmul.f32 %v2665_v58, %v5794_v13  ;;  %v5799_v20 = vadd.f32 %v2721_v24, %v2607_v1  ;;  %v1113_v11 = vadd.f32 %v5785_v26, %v1112_v21 }
 0x1e2   : > { %1428 = vrot.lane.b32.xlu0 %v4014_v12, %s4141_s30  ;;  %v2503_v54 = vsel %vm2502_vm12, %v5779_v41, %v2499_v47  ;;  %v1121_v41 = vor.u32 1.1754944e-38, %v1120_v46  ;;  %v6380_v47 = vld [vmem:[#allocation19_spill] sm:$0xff] }
 0x1e3   : > { %4015 = vtanh.f32 %v5799_v20  ;;  %2744 = vrot.lane.b32.xlu2 %v2699_v48, %s4141_s30  ;;  %v5832_v1 = vsel %vm2505_vm13, %v2507_v14, %v2503_v54  ;;  %v1117_v58 = vsel %vm1116_vm0, %v5785_v26, %v1113_v11  ;;  %v2610_v48 = vmul.f32 %v6377_v23, %v5256_v51  ;;  %v6383_v23 = vld [vmem:[#allocation5_spill] sm:$0xff] }
 0x1e4   : > { %v1281_v10 = vpop.permute.xlu0 %1280  ;;  %v5842_v5 = vsel %vm1119_vm2, %v1121_v41, %v1117_v58  ;;  %v2608_v2 = vmul.f32 %v6380_v47, %v5110_v55 }
 0x1e5   : > { %v1314_v63 = vmul.f32 %v1281_v10, %v5807_v31  ;;  %v1221_v10 = vmul.f32 %v6378_v44, %v5115_v3 }
 0x1e7   : > { %1360 = vrot.lane.b32.xlu1 %v1314_v63, %s4141_s30 }
 0x1e9   : > { %v4016_v29 = vpop.eup %4015 }
 0x1ea   : > { %v1339_v37 = vpop.permute.xlu2 %1338  ;;  %2816 = vrot.lane.b32.xlu0 %v4016_v29, %s4141_s30 }
 0x1eb   : > { %v5819_v34 = vadd.f32 %v1339_v37, %v1223_v60  ;;  %v1222_v60 = vmul.f32 %v6379_v8, %v5188_v19 }
 0x1ed   : > { %4017 = vtanh.f32 %v5819_v34  ;;  %v2719_v6 = vpop.permute.xlu1 %2718 }
 0x1ee   : > { %v5836_v12 = vadd.f32 %v2719_v6, %v2606_v52  ;;  %v6381_v6 = vld [vmem:[#allocation9_spill] sm:$0xff] }
 0x1ef   : > { %v1226_v14 = vmul.f32 %v6381_v6, %v5435_v22  ;;  %v6388_v6 = vld [vmem:[#allocation8_spill] sm:$0xff] }
 0x1f0   : > { %v2669_v7 = vpop.permute.xlu0 %2668  ;;  %4019 = vtanh.f32 %v5836_v12 }
 0x1f1   : > { %v2701_v27 = vmul.f32 %v2669_v7, %v5832_v1  ;;  %v6382_v7 = vld [vmem:[#allocation20_spill] sm:$0xff] }
 0x1f2   : > { %v2609_v58 = vmul.f32 %v6382_v7, %v5123_v0 }
 0x1f3   : > { %v4018_v24 = vpop.eup %4017  ;;  %2748 = vrot.lane.b32.xlu1 %v2701_v27, %s4141_s30 }
 0x1f4   : > { %1434 = vrot.lane.b32.xlu0 %v4018_v24, %s4141_s30 }
 0x1f5   : > { %v1283_v49 = vpop.permute.xlu1 %1282  ;;  %v2727_v26 = vpop.permute.xlu2 %2726 }
 0x1f6   : > { %v1315_v50 = vmul.f32 %v1283_v49, %v5842_v5  ;;  %v5845_v17 = vadd.f32 %v2727_v26, %v2610_v48  ;;  %v4020_v37 = vpop.eup %4019  ;;  %v1224_v48 = vmul.f32 %v6383_v23, %v5307_v38 }
 0x1f8   : > { %1362 = vrot.lane.b32.xlu2 %v1315_v50, %s4141_s30  ;;  %4021 = vtanh.f32 %v5845_v17 }
 0x1f9   : > { %v1335_v15 = vpop.permute.xlu0 %1334 }
 0x1fa   : > { %v5852_v63 = vadd.f32 %v1335_v15, %v1221_v10  ;;  %v6384_v10 = vld [vmem:[#allocation24_spill] sm:$0xff] }
 0x1fb   : > { %v2613_v15 = vmul.f32 %v6384_v10, %v5499_v9 }
 0x1fc   : > { %4023 = vtanh.f32 %v5852_v63 }
 0x1fd   : > { %v1337_v29 = vpop.permute.xlu1 %1336 }
 0x1fe   : > { %v5857_v32 = vadd.f32 %v1337_v29, %v1222_v60  ;;  %v4022_v21 = vpop.eup %4021 }
 0x1ff   : > { %2822 = vrot.lane.b32.xlu0 %v4022_v21, %s4141_s30  ;;  %v6386_v21 = vld [vmem:[#allocation22_spill] sm:$0xff] }
 0x200   : > { %4025 = vtanh.f32 %v5857_v32  ;;  %2814 = vrot.lane.b32.xlu2 %v4020_v37, %s4141_s30  ;;  %v6385_v37 = vld [vmem:[#allocation33_spill] sm:$0xff] }
 0x201   : > { %v2723_v11 = vpop.permute.xlu0 %2722  ;;  %v2611_v47 = vmul.f32 %v6386_v21, %v6385_v37  ;;  %v6392_v21 = vld [vmem:[#allocation23_spill] sm:$0xff] }
 0x202   : > { %v1345_v54 = vpop.permute.xlu2 %1344  ;;  %v4024_v46 = vpop.eup %4023  ;;  %v5866_v28 = vadd.f32 %v2723_v11, %v2608_v2  ;;  %v6387_v2 = vld [vmem:[#allocation34_spill] sm:$0xff] }
 0x203   : > { %v5868_v52 = vadd.f32 %v1345_v54, %v1226_v14  ;;  %1430 = vrot.lane.b32.xlu1 %v4024_v46, %s4141_s30  ;;  %v1225_v14 = vmul.f32 %v6388_v6, %v6387_v2 }
 0x204   : > { %4027 = vtanh.f32 %v5866_v28 }
 0x205   : > { %4029 = vtanh.f32 %v5868_v52  ;;  %v2725_v27 = vpop.permute.xlu1 %2724 }
 0x206   : > { %v4026_v24 = vpop.eup %4025  ;;  %v5875_v41 = vadd.f32 %v2725_v27, %v2609_v58  ;;  %v6389_v27 = vld [vmem:[#allocation12_spill] sm:$0xff] }
 0x207   : > { %v1227_v23 = vmul.f32 %v6389_v27, %v5433_v33 }
 0x208   : > { %1432 = vrot.lane.b32.xlu2 %v4026_v24, %s4141_s30  ;;  %4031 = vtanh.f32 %v5875_v41 }
 0x209   : > { %v1341_v49 = vpop.permute.xlu0 %1340 }
 0x20a   : > { %v4028_v50 = vpop.eup %4027  ;;  %v5881_v26 = vadd.f32 %v1341_v49, %v1224_v48  ;;  %v6390_v48 = vld [vmem:[#allocation11_spill] sm:$0xff] }
 0x20b   : > { %v4030_v44 = vpop.eup %4029  ;;  %2818 = vrot.lane.b32.xlu1 %v4028_v50, %s4141_s30  ;;  %v1229_v49 = vmul.f32 %v6390_v48, %v5631_v45  ;;  %v6394_v48 = vld [vmem:[#allocation26_spill] sm:$0xff] }
 0x20c   : > { %4033 = vtanh.f32 %v5881_v26  ;;  %1440 = vrot.lane.b32.xlu0 %v4030_v44, %s4141_s30 }
 0x20e   : > { %v4032_v60 = vpop.eup %4031 }
 0x20f   : > { %v2733_v8 = vpop.permute.xlu2 %2732 }
 0x210   : > { %v5888_v29 = vadd.f32 %v2733_v8, %v2613_v15  ;;  %2820 = vrot.lane.b32.xlu2 %v4032_v60, %s4141_s30 }
 0x211   : > { %v2729_v11 = vpop.permute.xlu0 %2728  ;;  %v1343_v54 = vpop.permute.xlu1 %1342 }
 0x212   : > { %4035 = vtanh.f32 %v5888_v29  ;;  %v4034_v46 = vpop.eup %4033  ;;  %v5896_v7 = vadd.f32 %v2729_v11, %v2611_v47  ;;  %v5898_v58 = vadd.f32 %v1343_v54, %v1225_v14  ;;  %v2612_v47 = vmul.f32 %v6392_v21, %v5460_v35  ;;  %v6393_v11 = vld [vmem:[#allocation25_spill] sm:$0xff] }
 0x213   : > { %1436 = vrot.lane.b32.xlu1 %v4034_v46, %s4141_s30  ;;  %v2614_v54 = vmul.f32 %v6393_v11, %v5507_v4 }
 0x214   : > { %4037 = vtanh.f32 %v5896_v7 }
 0x215   : > { %4039 = vtanh.f32 %v5898_v58 }
 0x218   : > { %v4036_v24 = vpop.eup %4035 }
 0x219   : > { %2828 = vrot.lane.b32.xlu0 %v4036_v24, %s4141_s30 }
 0x21a   : > { %v1347_v50 = vpop.permute.xlu0 %1346  ;;  %v4038_v10 = vpop.eup %4037 }
 0x21b   : > { %v1351_v44 = vpop.permute.xlu2 %1350  ;;  %v5908_v15 = vadd.f32 %v1347_v50, %v1227_v23  ;;  %v4040_v60 = vpop.eup %4039  ;;  %2824 = vrot.lane.b32.xlu1 %v4038_v10, %s4141_s30 }
 0x21c   : > { %v5910_v8 = vadd.f32 %v1351_v44, %v1229_v49  ;;  %1438 = vrot.lane.b32.xlu2 %v4040_v60, %s4141_s30  ;;  %v2616_v49 = vmul.f32 %v6394_v48, %v5680_v39  ;;  %v6396_v60 = vld [vmem:[#allocation15_spill] sm:$0xff] }
 0x21d   : > { %4041 = vtanh.f32 %v5908_v15  ;;  %v1230_v21 = vmul.f32 %v6396_v60, %v5563_v62 }
 0x21e   : > { %6391 = vst [vmem:[#allocation21_spill] sm:$0xff] %v5910_v8  ;;  %4043 = vtanh.f32 %v5910_v8  ;;  %v2731_v6 = vpop.permute.xlu1 %2730 }
 0x21f   : > { %v5918_v14 = vadd.f32 %v2731_v6, %v2612_v47  ;;  %v6397_v47 = vld [vmem:[#allocation10_spill] sm:$0xff] }
 0x220   : > { %v1228_v6 = vmul.f32 %v6397_v47, %v5565_v18 }
 0x221   : > { %4045 = vtanh.f32 %v5918_v14 }
 0x223   : > { %v2735_v46 = vpop.permute.xlu0 %2734  ;;  %v4042_v24 = vpop.eup %4041 }
 0x224   : > { %v5923_v27 = vadd.f32 %v2735_v46, %v2614_v54  ;;  %v4044_v23 = vpop.eup %4043  ;;  %1442 = vrot.lane.b32.xlu1 %v4042_v24, %s4141_s30 }
 0x225   : > { %1446 = vrot.lane.b32.xlu0 %v4044_v23, %s4141_s30 }
 0x226   : > { %4047 = vtanh.f32 %v5923_v27  ;;  %v2739_v50 = vpop.permute.xlu2 %2738 }
 0x227   : > { %v4046_v44 = vpop.eup %4045  ;;  %v5930_v10 = vadd.f32 %v2739_v50, %v2616_v49  ;;  %v6398_v49 = vld [vmem:[#allocation28_spill] sm:$0xff] }
 0x228   : > { %2826 = vrot.lane.b32.xlu2 %v4046_v44, %s4141_s30  ;;  %v2617_v50 = vmul.f32 %v6398_v49, %v5627_v16  ;;  %v6399_v44 = vld [vmem:[#allocation14_spill] sm:$0xff] }
 0x229   : > { %6395 = vst [vmem:[#allocation6_spill] sm:$0xff] %v5930_v10  ;;  %4049 = vtanh.f32 %v5930_v10  ;;  %v1232_v60 = vmul.f32 %v6399_v44, %v5759_v59  ;;  %v6402_v10 = vld [vmem:[#allocation27_spill] sm:$0xff] }
 0x22a   : > { %v2615_v8 = vmul.f32 %v6402_v10, %v5658_v61  ;;  %v6406_v10 = vld [vmem:[#allocation29_spill] sm:$0xff] }
 0x22b   : > { %v1353_v11 = vpop.permute.xlu0 %1352  ;;  %v1349_v54 = vpop.permute.xlu1 %1348 }
 0x22c   : > { %v4048_v46 = vpop.eup %4047  ;;  %v5938_v24 = vadd.f32 %v1353_v11, %v1230_v21  ;;  %v5940_v23 = vadd.f32 %v1349_v54, %v1228_v6 }
 0x22d   : > { %2830 = vrot.lane.b32.xlu1 %v4048_v46, %s4141_s30 }
 0x22e   : > { %4051 = vtanh.f32 %v5938_v24 }
 0x22f   : > { %4053 = vtanh.f32 %v5940_v23  ;;  %v4050_v48 = vpop.eup %4049 }
 0x230   : > { %2834 = vrot.lane.b32.xlu0 %v4050_v48, %s4141_s30  ;;  %v1357_v21 = vpop.permute.xlu2 %1356 }
 0x231   : > { %v5952_v54 = vadd.f32 %v1357_v21, %v1232_v60 }
 0x233   : > { %v2741_v47 = vpop.permute.xlu0 %2740  ;;  %6401 = vst [vmem:[#allocation19_spill] sm:$0xff] %v5952_v54 }
 0x234   : > { %v4052_v11 = vpop.eup %4051  ;;  %v5950_v6 = vadd.f32 %v2741_v47, %v2617_v50  ;;  %v6404_v50 = vld [vmem:[#allocation18_spill] sm:$0xff] }
 0x235   : > { %v4054_v46 = vpop.eup %4053  ;;  %1448 = vrot.lane.b32.xlu1 %v4052_v11, %s4141_s30  ;;  %v1233_v44 = vmul.f32 %v6404_v50, %v5683_v25  ;;  %v6408_v50 = vld [vmem:[#allocation13_spill] sm:$0xff] }
 0x236   : > { %6400 = vst [vmem:[#allocation7_spill] sm:$0xff] %v5950_v6  ;;  %4055 = vtanh.f32 %v5950_v6  ;;  %1444 = vrot.lane.b32.xlu2 %v4054_v46, %s4141_s30  ;;  %v2619_v46 = vmul.f32 %v6406_v10, %v5794_v13  ;;  %v6410_v10 = vld [vmem:[#allocation31_spill] sm:$0xff] }
 0x237   : > { %4057 = vtanh.f32 %v5952_v54  ;;  %v2737_v48 = vpop.permute.xlu1 %2736 }
 0x238   : > { %v5960_v49 = vadd.f32 %v2737_v48, %v2615_v8 }
 0x23a   : > { %6403 = vst [vmem:[#allocation9_spill] sm:$0xff] %v5960_v49  ;;  %4059 = vtanh.f32 %v5960_v49 }
 0x23b   : > { %v1359_v60 = vpop.permute.xlu0 %1358 }
 0x23c   : > { %v4056_v47 = vpop.eup %4055  ;;  %v5965_v21 = vadd.f32 %v1359_v60, %v1233_v44  ;;  %v1231_v44 = vmul.f32 %v6408_v50, %v5726_v43  ;;  %v6412_v50 = vld [vmem:[#allocation30_spill] sm:$0xff] }
 0x23d   : > { %v4058_v11 = vpop.eup %4057  ;;  %2836 = vrot.lane.b32.xlu1 %v4056_v47, %s4141_s30  ;;  %v2745_v8 = vpop.permute.xlu2 %2744 }
 0x23e   : > { %6405 = vst [vmem:[#allocation20_spill] sm:$0xff] %v5965_v21  ;;  %4061 = vtanh.f32 %v5965_v21  ;;  %1452 = vrot.lane.b32.xlu0 %v4058_v11, %s4141_s30  ;;  %v5972_v54 = vadd.f32 %v2745_v8, %v2619_v46  ;;  %v2620_v11 = vmul.f32 %v6410_v10, %v5736_v30 }
 0x240   : > { %v4060_v48 = vpop.eup %4059  ;;  %6407 = vst [vmem:[#allocation5_spill] sm:$0xff] %v5972_v54  ;;  %4063 = vtanh.f32 %v5972_v54 }
 0x241   : > { %2832 = vrot.lane.b32.xlu2 %v4060_v48, %s4141_s30 }
 0x242   : > { %v1355_v47 = vpop.permute.xlu1 %1354 }
 0x243   : > { %v5978_v49 = vadd.f32 %v1355_v47, %v1231_v44  ;;  %v2618_v44 = vmul.f32 %v6412_v50, %v5765_v53 }
 0x244   : > { %v4062_v60 = vpop.eup %4061 }
 0x245   : > { %6409 = vst [vmem:[#allocation24_spill] sm:$0xff] %v5978_v49  ;;  %1454 = vrot.lane.b32.xlu1 %v4062_v60, %s4141_s30  ;;  %4065 = vtanh.f32 %v5978_v49  ;;  %v2747_v46 = vpop.permute.xlu0 %2746 }
 0x246   : > { %v4064_v8 = vpop.eup %4063  ;;  %v5984_v21 = vadd.f32 %v2747_v46, %v2620_v11 }
 0x247   : > { %2840 = vrot.lane.b32.xlu0 %v4064_v8, %s4141_s30 }
 0x248   : > { %6411 = vst [vmem:[#allocation33_spill] sm:$0xff] %v5984_v21  ;;  %4067 = vtanh.f32 %v5984_v21  ;;  %v6414_v21 = vld [vmem:[#allocation17_spill] sm:$0xff] }
 0x249   : > { %v1235_v49 = vmul.f32 %v6414_v21, %v5842_v5 }
 0x24b   : > { %v4066_v48 = vpop.eup %4065 }
 0x24c   : > { %1450 = vrot.lane.b32.xlu2 %v4066_v48, %s4141_s30 }
 0x24d   : > { %v2743_v47 = vpop.permute.xlu1 %2742 }
 0x24e   : > { %v5991_v60 = vadd.f32 %v2743_v47, %v2618_v44  ;;  %v4068_v10 = vpop.eup %4067  ;;  %v6415_v44 = vld [vmem:[#allocation16_spill] sm:$0xff] }
 0x24f   : > { %2842 = vrot.lane.b32.xlu1 %v4068_v10, %s4141_s30  ;;  %v1234_v47 = vmul.f32 %v6415_v44, %v5807_v31 }
 0x250   : > { %6413 = vst [vmem:[#allocation22_spill] sm:$0xff] %v5991_v60  ;;  %4069 = vtanh.f32 %v5991_v60 }
 0x252   : > { %v1363_v11 = vpop.permute.xlu2 %1362 }
 0x253   : > { %v6000_v48 = vadd.f32 %v1363_v11, %v1235_v49 }
 0x254   : > { %v1429_v46 = vpop.permute.xlu0 %1428 }
 0x255   : > { %v1476_v8 = vmul.f32 %v1429_v46, %v5076_v57  ;;  %4071 = vtanh.f32 %v6000_v48 }
 0x256   : > { %v4070_v54 = vpop.eup %4069 }
 0x257   : > { %2838 = vrot.lane.b32.xlu2 %v4070_v54, %s4141_s30  ;;  %1508 = vrot.lane.b32.xlu1 %v1476_v8, %s4142_s22 }
 0x259   : > { %v1361_v60 = vpop.permute.xlu1 %1360 }
 0x25a   : > { %v2815_v50 = vpop.permute.xlu2 %2814  ;;  %v6005_v6 = vadd.f32 %v1361_v60, %v1234_v47  ;;  %v6416_v60 = vld [vmem:[#allocation32_spill] sm:$0xff] }
 0x25b   : > { %v2862_v10 = vmul.f32 %v2815_v50, %v4948_v56  ;;  %v4072_v49 = vpop.eup %4071  ;;  %v2621_v11 = vmul.f32 %v6416_v60, %v5832_v1 }
 0x25c   : > { %v2817_v57 = vpop.permute.xlu0 %2816  ;;  %4073 = vtanh.f32 %v6005_v6 }
 0x25d   : > { %2894 = vrot.lane.b32.xlu0 %v2862_v10, %s4142_s22  ;;  %v2863_v54 = vmul.f32 %v2817_v57, %v4994_v36 }
 0x25f   : > { %2896 = vrot.lane.b32.xlu1 %v2863_v54, %s4142_s22 }
 0x262   : > { %v4074_v21 = vpop.eup %4073  ;;  %v1433_v56 = vpop.permute.xlu2 %1432 }
 0x263   : > { %1456 = vrot.lane.b32.xlu2 %v4074_v21, %s4141_s30  ;;  %v1478_v36 = vmul.f32 %v1433_v56, %v5188_v19 }
 0x265   : > { %1458 = vrot.lane.b32.xlu0 %v4072_v49, %s4141_s30  ;;  %v2749_v8 = vpop.permute.xlu1 %2748 }
 0x266   : > { %v1435_v46 = vpop.permute.xlu0 %1434  ;;  %v6017_v44 = vadd.f32 %v2749_v8, %v2621_v11 }
 0x267   : > { %v1479_v50 = vmul.f32 %v1435_v46, %v5240_v42 }
 0x268   : > { %4075 = vtanh.f32 %v6017_v44 }
 0x269   : > { %1514 = vrot.lane.b32.xlu1 %v1479_v50, %s4142_s22 }
 0x26a   : > { %v2821_v10 = vpop.permute.xlu2 %2820 }
 0x26b   : > { %v2865_v54 = vmul.f32 %v2821_v10, %v5123_v0 }
 0x26d   : > { %1512 = vrot.lane.b32.xlu0 %v1478_v36, %s4142_s22 }
 0x26e   : > { %v4076_v47 = vpop.eup %4075 }
 0x26f   : > { %2844 = vrot.lane.b32.xlu2 %v4076_v47, %s4141_s30 }
 0x271   : > { %v2823_v57 = vpop.permute.xlu0 %2822 }
 0x272   : > { %v2866_v49 = vmul.f32 %v2823_v57, %v5256_v51 }
 0x274   : > { %2902 = vrot.lane.b32.xlu1 %v2866_v49, %s4142_s22 }
 0x275   : > { %2900 = vrot.lane.b32.xlu0 %v2865_v54, %s4142_s22  ;;  %v1431_v42 = vpop.permute.xlu1 %1430 }
 0x276   : > { %v1477_v21 = vmul.f32 %v1431_v42, %v5115_v3  ;;  %v1439_v60 = vpop.permute.xlu2 %1438 }
 0x277   : > { %v1481_v19 = vmul.f32 %v1439_v60, %v6387_v2 }
 0x278   : > { %1510 = vrot.lane.b32.xlu2 %v1477_v21, %s4142_s22 }
 0x27d   : > { %1518 = vrot.lane.b32.xlu0 %v1481_v19, %s4142_s22  ;;  %v2819_v56 = vpop.permute.xlu1 %2818 }
 0x27e   : > { %v2864_v11 = vmul.f32 %v2819_v56, %v5110_v55  ;;  %v1441_v0 = vpop.permute.xlu0 %1440 }
 0x27f   : > { %v1482_v51 = vmul.f32 %v1441_v0, %v5435_v22 }
 0x280   : > { %2898 = vrot.lane.b32.xlu2 %v2864_v11, %s4142_s22 }
 0x281   : > { %1520 = vrot.lane.b32.xlu1 %v1482_v51, %s4142_s22 }
 0x282   : > { %v2827_v46 = vpop.permute.xlu2 %2826 }
 0x283   : > { %v2868_v3 = vmul.f32 %v2827_v46, %v5460_v35 }
 0x285   : > { %2906 = vrot.lane.b32.xlu0 %v2868_v3, %s4142_s22  ;;  %v1437_v8 = vpop.permute.xlu1 %1436 }
 0x286   : > { %v1480_v2 = vmul.f32 %v1437_v8, %v5307_v38 }
 0x288   : > { %1516 = vrot.lane.b32.xlu2 %v1480_v2, %s4142_s22 }
 0x28b   : > { %v2829_v50 = vpop.permute.xlu0 %2828 }
 0x28c   : > { %v2869_v55 = vmul.f32 %v2829_v50, %v5499_v9 }
 0x28d   : > { %v2825_v22 = vpop.permute.xlu1 %2824 }
 0x28e   : > { %2908 = vrot.lane.b32.xlu1 %v2869_v55, %s4142_s22  ;;  %v2867_v36 = vmul.f32 %v2825_v22, %v6385_v37 }
 0x290   : > { %v1445_v47 = vpop.permute.xlu2 %1444  ;;  %2904 = vrot.lane.b32.xlu2 %v2867_v36, %s4142_s22 }
 0x291   : > { %v1484_v10 = vmul.f32 %v1445_v47, %v5565_v18 }
 0x293   : > { %1524 = vrot.lane.b32.xlu0 %v1484_v10, %s4142_s22 }
 0x296   : > { %v1443_v35 = vpop.permute.xlu1 %1442 }
 0x297   : > { %v1483_v38 = vmul.f32 %v1443_v35, %v5433_v33  ;;  %v1447_v57 = vpop.permute.xlu0 %1446 }
 0x298   : > { %v1485_v54 = vmul.f32 %v1447_v57, %v5631_v45 }
 0x299   : > { %1522 = vrot.lane.b32.xlu2 %v1483_v38, %s4142_s22 }
 0x29a   : > { %1526 = vrot.lane.b32.xlu1 %v1485_v54, %s4142_s22 }
 0x29b   : > { %v2833_v9 = vpop.permute.xlu2 %2832 }
 0x29c   : > { %v2871_v37 = vmul.f32 %v2833_v9, %v5658_v61 }
 0x29e   : > { %2912 = vrot.lane.b32.xlu0 %v2871_v37, %s4142_s22 }
 0x29f   : > { %v2831_v18 = vpop.permute.xlu1 %2830 }
 0x2a0   : > { %v2870_v49 = vmul.f32 %v2831_v18, %v5507_v4 }
 0x2a2   : > { %2910 = vrot.lane.b32.xlu2 %v2870_v49, %s4142_s22  ;;  %v2835_v42 = vpop.permute.xlu0 %2834 }
 0x2a3   : > { %v2872_v33 = vmul.f32 %v2835_v42, %v5680_v39 }
 0x2a5   : > { %2914 = vrot.lane.b32.xlu1 %v2872_v33, %s4142_s22 }
 0x2a6   : > { %v1451_v60 = vpop.permute.xlu2 %1450 }
 0x2a7   : > { %v1449_v45 = vpop.permute.xlu1 %1448  ;;  %v1487_v19 = vmul.f32 %v1451_v60, %v5726_v43 }
 0x2a8   : > { %v1486_v21 = vmul.f32 %v1449_v45, %v5563_v62 }
 0x2a9   : > { %1530 = vrot.lane.b32.xlu0 %v1487_v19, %s4142_s22 }
 0x2aa   : > { %1528 = vrot.lane.b32.xlu2 %v1486_v21, %s4142_s22 }
 0x2af   : > { %v2837_v61 = vpop.permute.xlu1 %2836 }
 0x2b0   : > { %v2873_v4 = vmul.f32 %v2837_v61, %v5627_v16  ;;  %v1453_v56 = vpop.permute.xlu0 %1452 }
 0x2b1   : > { %v1488_v11 = vmul.f32 %v1453_v56, %v5759_v59  ;;  %v2839_v39 = vpop.permute.xlu2 %2838 }
 0x2b2   : > { %2916 = vrot.lane.b32.xlu2 %v2873_v4, %s4142_s22  ;;  %v2874_v62 = vmul.f32 %v2839_v39, %v5765_v53 }
 0x2b3   : > { %1532 = vrot.lane.b32.xlu1 %v1488_v11, %s4142_s22 }
 0x2b4   : > { %2918 = vrot.lane.b32.xlu0 %v2874_v62, %s4142_s22 }
 0x2b7   : > { %v1455_v43 = vpop.permute.xlu1 %1454 }
 0x2b8   : > { %v1489_v0 = vmul.f32 %v1455_v43, %v5683_v25 }
 0x2b9   : > { %v2841_v53 = vpop.permute.xlu0 %2840 }
 0x2ba   : > { %1534 = vrot.lane.b32.xlu2 %v1489_v0, %s4142_s22 }
 0x2bd   : > { %v1457_v16 = vpop.permute.xlu2 %1456 }
 0x2be   : > { %v1490_v51 = vmul.f32 %v1457_v16, %v5807_v31 }
 0x2c0   : > { %1536 = vrot.lane.b32.xlu0 %v1490_v51, %s4142_s22 }
 0x2c1   : > { %v2843_v46 = vpop.permute.xlu1 %2842 }
 0x2c2   : > { %v2876_v59 = vmul.f32 %v2843_v46, %v5736_v30 }
 0x2c4   : > { %2922 = vrot.lane.b32.xlu2 %v2876_v59, %s4142_s22 }
 0x2c9   : > { %v1509_v3 = vpop.permute.xlu1 %1508  ;;  %v2845_v25 = vpop.permute.xlu2 %2844 }
 0x2ca   : > { %v1557_v8 = vsel %vm1556_vm3, %v1509_v3, %v5774_v40  ;;  %v2877_v31 = vmul.f32 %v2845_v25, %v5832_v1 }
 0x2cb   : > { %v1574_v2 = vsel %vm1573_vm5, %v1557_v8, 0.0 }
 0x2cc   : > { %1590 = vst [vmem:[%s6079_s29] sm:$0xff] %v1574_v2  ;;  %2924 = vrot.lane.b32.xlu0 %v2877_v31, %s4142_s22  ;;  %v6417_v2 = vld [vmem:[#allocation7_spill] sm:$0xff] }
 0x2cf   : > { %v2895_v30 = vpop.permute.xlu0 %2894 }
 0x2d0   : > { %v2942_v50 = vsel %vm1556_vm3, %v2895_v30, %v5836_v12 }
 0x2d1   : > { %v2958_v55 = vsel %vm1573_vm5, %v2942_v50, 0.0  ;;  %v2897_v40 = vpop.permute.xlu1 %2896 }
 0x2d2   : > { %2974 = vst [vmem:[%s6079_s29 + $0x80] sm:$0xff] %v2958_v55  ;;  %v1511_v1 = vpop.permute.xlu2 %1510  ;;  %v2943_v22 = vsel %vm1556_vm3, %v2897_v40, %v5799_v20 }
 0x2d3   : > { %v1558_v36 = vsel %vm1556_vm3, %v1511_v1, %v5852_v63  ;;  %v2959_v47 = vsel %vm1573_vm5, %v2943_v22, 0.0  ;;  %v6419_v22 = vld [vmem:[#allocation9_spill] sm:$0xff] }
 0x2d4   : > { %v1575_v10 = vsel %vm1573_vm5, %v1558_v36, 0.0  ;;  %2975 = vst [vmem:[%s6079_s29 + $0x88] sm:$0xff] %v2959_v47 }
 0x2d5   : > { %1591 = vst [vmem:[%s6079_s29 + $0x8] sm:$0xff] %v1575_v10 }
 0x2d7   : > { %v1459_v12 = vpop.permute.xlu0 %1458 }
 0x2d8   : > { %v1491_v35 = vmul.f32 %v1459_v12, %v5842_v5  ;;  %v2875_v5 = vmul.f32 %v2841_v53, %v5794_v13  ;;  %v6420_v12 = vld [vmem:[#allocation20_spill] sm:$0xff] }
 0x2da   : > { %1538 = vrot.lane.b32.xlu1 %v1491_v35, %s4142_s22  ;;  %v2899_v38 = vpop.permute.xlu2 %2898 }
 0x2db   : > { %v1515_v57 = vpop.permute.xlu1 %1514  ;;  %v2944_v20 = vsel %vm1556_vm3, %v2899_v38, %v5866_v28 }
 0x2dc   : > { %v1560_v63 = vsel %vm1556_vm3, %v1515_v57, %v5819_v34  ;;  %v2960_v54 = vsel %vm1573_vm5, %v2944_v20, 0.0  ;;  %v6421_v20 = vld [vmem:[#allocation6_spill] sm:$0xff] }
 0x2dd   : > { %v1577_v9 = vsel %vm1573_vm5, %v1560_v63, 0.0  ;;  %2976 = vst [vmem:[%s6079_s29 + $0x90] sm:$0xff] %v2960_v54 }
 0x2de   : > { %1593 = vst [vmem:[%s6079_s29 + $0x18] sm:$0xff] %v1577_v9 }
 0x2df   : > { %v1513_v37 = vpop.permute.xlu0 %1512 }
 0x2e0   : > { %v1559_v18 = vsel %vm1556_vm3, %v1513_v37, %v5857_v32  ;;  %v6422_v37 = vld [vmem:[#allocation24_spill] sm:$0xff] }
 0x2e1   : > { %v1576_v49 = vsel %vm1573_vm5, %v1559_v18, 0.0 }
 0x2e2   : > { %1592 = vst [vmem:[%s6079_s29 + $0x10] sm:$0xff] %v1576_v49  ;;  %2920 = vrot.lane.b32.xlu1 %v2875_v5, %s4142_s22  ;;  %v1517_v34 = vpop.permute.xlu2 %1516 }
 0x2e3   : > { %v1561_v28 = vsel %vm1556_vm3, %v1517_v34, %v5881_v26  ;;  %v6423_v34 = vld [vmem:[#allocation33_spill] sm:$0xff] }
 0x2e4   : > { %v1578_v42 = vsel %vm1573_vm5, %v1561_v28, 0.0 }
 0x2e5   : > { %1594 = vst [vmem:[%s6079_s29 + $0x20] sm:$0xff] %v1578_v42 }
 0x2e6   : > { %v2903_v33 = vpop.permute.xlu1 %2902 }
 0x2e7   : > { %v2901_v13 = vpop.permute.xlu0 %2900  ;;  %v2946_v45 = vsel %vm1556_vm3, %v2903_v33, %v5845_v17 }
 0x2e8   : > { %v2945_v32 = vsel %vm1556_vm3, %v2901_v13, %v5875_v41  ;;  %v2962_v21 = vsel %vm1573_vm5, %v2946_v45, 0.0  ;;  %v6424_v13 = vld [vmem:[#allocation19_spill] sm:$0xff] }
 0x2e9   : > { %v2961_v60 = vsel %vm1573_vm5, %v2945_v32, 0.0  ;;  %2978 = vst [vmem:[%s6079_s29 + $0xa0] sm:$0xff] %v2962_v21 }
 0x2ea   : > { %2977 = vst [vmem:[%s6079_s29 + $0x98] sm:$0xff] %v2961_v60  ;;  %v2905_v26 = vpop.permute.xlu2 %2904  ;;  %v6425_v60 = vld [vmem:[#allocation22_spill] sm:$0xff] }
 0x2eb   : > { %v2947_v19 = vsel %vm1556_vm3, %v2905_v26, %v5896_v7 }
 0x2ec   : > { %v2963_v61 = vsel %vm1573_vm5, %v2947_v19, 0.0 }
 0x2ed   : > { %2979 = vst [vmem:[%s6079_s29 + $0xa8] sm:$0xff] %v2963_v61 }
 0x2ef   : > { %v1519_v17 = vpop.permute.xlu0 %1518 }
 0x2f0   : > { %v1562_v41 = vsel %vm1556_vm3, %v1519_v17, %v5898_v58 }
 0x2f1   : > { %v1579_v4 = vsel %vm1573_vm5, %v1562_v41, 0.0 }
 0x2f2   : > { %1595 = vst [vmem:[%s6079_s29 + $0x28] sm:$0xff] %v1579_v4 }
 0x2f3   : > { %v1523_v56 = vpop.permute.xlu2 %1522  ;;  %v1521_v39 = vpop.permute.xlu1 %1520 }
 0x2f4   : > { %v1564_v11 = vsel %vm1556_vm3, %v1523_v56, %v5908_v15  ;;  %v1563_v7 = vsel %vm1556_vm3, %v1521_v39, %v5868_v52 }
 0x2f5   : > { %v1581_v62 = vsel %vm1573_vm5, %v1564_v11, 0.0  ;;  %v1580_v43 = vsel %vm1573_vm5, %v1563_v7, 0.0 }
 0x2f6   : > { %1597 = vst [vmem:[%s6079_s29 + $0x38] sm:$0xff] %v1581_v62 }
 0x2f7   : > { %1596 = vst [vmem:[%s6079_s29 + $0x30] sm:$0xff] %v1580_v43  ;;  %v2907_v58 = vpop.permute.xlu0 %2906 }
 0x2f8   : > { %v2948_v0 = vsel %vm1556_vm3, %v2907_v58, %v5918_v14 }
 0x2f9   : > { %v2964_v16 = vsel %vm1573_vm5, %v2948_v0, 0.0 }
 0x2fa   : > { %2980 = vst [vmem:[%s6079_s29 + $0xb0] sm:$0xff] %v2964_v16 }
 0x2fc   : > { %v2911_v15 = vpop.permute.xlu2 %2910 }
 0x2fd   : > { %v2950_v51 = vsel %vm1556_vm3, %v2911_v15, %v5923_v27 }
 0x2fe   : > { %v2966_v46 = vsel %vm1573_vm5, %v2950_v51, 0.0 }
 0x2ff   : > { %2982 = vst [vmem:[%s6079_s29 + $0xc0] sm:$0xff] %v2966_v46 }
 0x300   : > { %v2909_v52 = vpop.permute.xlu1 %2908 }
 0x301   : > { %v2949_v59 = vsel %vm1556_vm3, %v2909_v52, %v5888_v29 }
 0x302   : > { %v2965_v53 = vsel %vm1573_vm5, %v2949_v59, 0.0 }
 0x303   : > { %2981 = vst [vmem:[%s6079_s29 + $0xb8] sm:$0xff] %v2965_v53 }
 0x304   : > { %v1529_v14 = vpop.permute.xlu2 %1528 }
 0x305   : > { %v1567_v3 = vsel %vm1556_vm3, %v1529_v14, %v5938_v24  ;;  %v1525_v25 = vpop.permute.xlu0 %1524  ;;  %v6418_v24 = vld [vmem:[#allocation21_spill] sm:$0xff] }
 0x306   : > { %v1584_v8 = vsel %vm1573_vm5, %v1567_v3, 0.0  ;;  %v1565_v27 = vsel %vm1556_vm3, %v1525_v25, %v5940_v23 }
 0x307   : > { %1600 = vst [vmem:[%s6079_s29 + $0x50] sm:$0xff] %v1584_v8  ;;  %v1582_v31 = vsel %vm1573_vm5, %v1565_v27, 0.0 }
 0x308   : > { %1598 = vst [vmem:[%s6079_s29 + $0x40] sm:$0xff] %v1582_v31 }
 0x30c   : > { %v2917_v29 = vpop.permute.xlu2 %2916  ;;  %v1527_v50 = vpop.permute.xlu1 %1526 }
 0x30d   : > { %v2953_v30 = vsel %vm1556_vm3, %v2917_v29, %v6417_v2  ;;  %v1566_v40 = vsel %vm1556_vm3, %v1527_v50, %v6418_v24 }
 0x30e   : > { %v2969_v55 = vsel %vm1573_vm5, %v2953_v30, 0.0  ;;  %v1583_v1 = vsel %vm1573_vm5, %v1566_v40, 0.0 }
 0x30f   : > { %2985 = vst [vmem:[%s6079_s29 + $0xd8] sm:$0xff] %v2969_v55 }
 0x310   : > { %1599 = vst [vmem:[%s6079_s29 + $0x48] sm:$0xff] %v1583_v1  ;;  %v2913_v23 = vpop.permute.xlu0 %2912 }
 0x311   : > { %v2951_v36 = vsel %vm1556_vm3, %v2913_v23, %v6419_v22 }
 0x312   : > { %v2967_v47 = vsel %vm1573_vm5, %v2951_v36, 0.0 }
 0x313   : > { %2983 = vst [vmem:[%s6079_s29 + $0xc8] sm:$0xff] %v2967_v47 }
 0x314   : > { %v1535_v10 = vpop.permute.xlu2 %1534 }
 0x315   : > { %v1570_v35 = vsel %vm1556_vm3, %v1535_v10, %v6420_v12 }
 0x316   : > { %v1587_v38 = vsel %vm1573_vm5, %v1570_v35, 0.0 }
 0x317   : > { %1603 = vst [vmem:[%s6079_s29 + $0x68] sm:$0xff] %v1587_v38  ;;  %v2915_v57 = vpop.permute.xlu1 %2914 }
 0x318   : > { %v2952_v63 = vsel %vm1556_vm3, %v2915_v57, %v6421_v20 }
 0x319   : > { %v2968_v54 = vsel %vm1573_vm5, %v2952_v63, 0.0 }
 0x31a   : > { %2984 = vst [vmem:[%s6079_s29 + $0xd0] sm:$0xff] %v2968_v54 }
 0x31b   : > { %v1531_v9 = vpop.permute.xlu0 %1530 }
 0x31c   : > { %v1568_v5 = vsel %vm1556_vm3, %v1531_v9, %v6422_v37 }
 0x31d   : > { %v1585_v18 = vsel %vm1573_vm5, %v1568_v5, 0.0 }
 0x31e   : > { %1601 = vst [vmem:[%s6079_s29 + $0x58] sm:$0xff] %v1585_v18  ;;  %v2923_v49 = vpop.permute.xlu2 %2922 }
 0x31f   : > { %v2956_v28 = vsel %vm1556_vm3, %v2923_v49, %v6423_v34 }
 0x320   : > { %v2972_v42 = vsel %vm1573_vm5, %v2956_v28, 0.0 }
 0x321   : > { %2988 = vst [vmem:[%s6079_s29 + $0xf0] sm:$0xff] %v2972_v42 }
 0x325   : > { %v1533_v33 = vpop.permute.xlu1 %1532 }
 0x326   : > { %v1569_v45 = vsel %vm1556_vm3, %v1533_v33, %v6424_v13  ;;  %v2919_v21 = vpop.permute.xlu0 %2918 }
 0x327   : > { %v1586_v32 = vsel %vm1573_vm5, %v1569_v45, 0.0  ;;  %v2954_v26 = vsel %vm1556_vm3, %v2919_v21, %v6425_v60 }
 0x328   : > { %1602 = vst [vmem:[%s6079_s29 + $0x60] sm:$0xff] %v1586_v32  ;;  %v2970_v19 = vsel %vm1573_vm5, %v2954_v26, 0.0 }
 0x329   : > { %2986 = vst [vmem:[%s6079_s29 + $0xe0] sm:$0xff] %v2970_v19 }
 0x332   : > { %v1537_v61 = vpop.permute.xlu0 %1536 }
 0x333   : > { %v1571_v17 = vsel %vm1556_vm3, %v1537_v61, %v6005_v6 }
 0x334   : > { %v1588_v41 = vsel %vm1573_vm5, %v1571_v17, 0.0 }
 0x335   : > { %1604 = vst [vmem:[%s6079_s29 + $0x70] sm:$0xff] %v1588_v41 }
 0x33e   : > { %v2925_v4 = vpop.permute.xlu0 %2924 }
 0x33f   : > { %v2957_v56 = vsel %vm1556_vm3, %v2925_v4, %v6017_v44  ;;  %v6426_v44 = vld [vmem:[#allocation5_spill] sm:$0xff] }
 0x340   : > { %v2973_v11 = vsel %vm1573_vm5, %v2957_v56, 0.0 }
 0x341   : > { %2989 = vst [vmem:[%s6079_s29 + $0xf8] sm:$0xff] %v2973_v11 }
 0x34c   : > { %v1539_v39 = vpop.permute.xlu1 %1538 }
 0x34d   : > { %v1572_v62 = vsel %vm1556_vm3, %v1539_v39, %v6000_v48 }
 0x34e   : > { %v1589_v7 = vsel %vm1573_vm5, %v1572_v62, 0.0 }
 0x34f   : > { %1605 = vst [vmem:[%s6079_s29 + $0x78] sm:$0xff] %v1589_v7 }
 0x354   : > { %v2921_v6 = vpop.permute.xlu1 %2920 }
 0x355   : > { %v2955_v43 = vsel %vm1556_vm3, %v2921_v6, %v6426_v44 }
 0x356   : > { %v2971_v58 = vsel %vm1573_vm5, %v2955_v43, 0.0 }
 0x357   : > { %2987 = vst [vmem:[%s6079_s29 + $0xe8] sm:$0xff] %v2971_v58 }
 0x358   : > { %4104 = shalt.err (!%p4101_p3)
}
 0x359   : > { %s4143_s22 = smov 128   ;;  %s4144_s23 = smov 8  }
 0x35a   : > { %3776 = dma.vmem_to_hbm [thread:$0]  (%p4208_p5), %s3004_s8, 4096, %s3006_s9, %s2991_s19, %s4143_s22, %s4143_s22, %s4144_s23  }
 0x35b PF: > { %p3782_p4 = scmp.ge.s32.totalorder %s4139_s18, 2  ;;  %s3020_s27 = sand.u32 1, %s4127_s15  }
 0x35c   : > { %s3021_s29 = scalar_lea.sflag [#allocation3], %s3020_s27 }
 0x35d   : > { %p3779_p7 = pnand %p3782_p4, %p4212_p6 }
 0x35f   : > { %p3780_p8 = pneg %p3779_p7 }
 0x361   : > { %4122 = dma.done.wait (%p3780_p8), %s3021_s29, 4096  }
 0x362   : > { %4124 = vsyncadd (%p3780_p8), %s3021_s29, 4294963200  ;;  %p14_p9 = scmp.ge.s32.totalorder %s4195_s21, 4   ;;  %s6427_s15 = smov %s4131_s16 }
 0x363   : > { %s6428_s16 = smov %s4135_s17  ;;  %s6429_s17 = smov %s4206_s24 }
 0x364   : > { %s6430_s18 = smov %s4195_s21  ;;  %16 = sbr.rel (!%p14_p9) target bundleno = 3 (0x3), region = 81 }
 0x369   :  { %3027 = vsyncpa [#allocation3], 1 }
 0x36a   :  { %3029 = vsyncpa [#allocation3 + $0x1], 1 }

</bundles_post_ra>
